<compile_context>
chip_gen: v5e
topology: v5e:2x2
jax: 0.10.0
libtpu: 0.0.40
codegen_flags: <defaults>
</compile_context>

<pallas_src>
import functools

import jax
import jax.numpy as jnp
from jax import lax
from jax.experimental import pallas as pl
from jax.experimental.pallas import tpu as pltpu

_MIB = 1024 * 1024

# Per-generation resource heuristics: (per-step VMEM budget, hard cap for
# vmem_limit_bytes, scoped-VMEM default, minimum number of grid steps).
_GEN_CONFIG = {
    "v5": dict(budget=48 * _MIB, cap=64 * _MIB, scoped=16 * _MIB,
               min_steps=2, prefer_even_steps=False),
    "v6": dict(budget=72 * _MIB, cap=96 * _MIB, scoped=32 * _MIB,
               min_steps=2, prefer_even_steps=False),
    # v7x: only 64 MiB VMEM per TensorCore and 2 TCs -> small blocks, >=4 even steps.
    "v7": dict(budget=20 * _MIB, cap=44 * _MIB, scoped=32 * _MIB,
               min_steps=4, prefer_even_steps=True),
    "unknown": dict(budget=24 * _MIB, cap=40 * _MIB, scoped=16 * _MIB,
                    min_steps=2, prefer_even_steps=False),
}


def _tpu_generation():
    try:
        kind = jax.devices()[0].device_kind.lower()
    except Exception:  # pragma: no cover - defensive
        return "unknown"
    for tag in ("v7", "v6", "v5"):
        if tag in kind:
            return tag
    return "unknown"


def fire_kernel(x_ref, wsq_ref, ssq_ref, tsq_ref, wexp_ref, sexp_ref, texp_ref,
                out_ref, *, w_valid):
    NB, H, Wp, Cin = x_ref.shape
    Csq = wsq_ref.shape[1]
    M = NB * H * Wp

    # Hoisted per-channel affine params (f32 rows; lane-aligned broadcasts).
    ssq = ssq_ref[...]
    tsq = tsq_ref[...]
    sexp = sexp_ref[...]
    texp = texp_ref[...]

    # ---- squeeze: 1x1 conv as bf16 MXU matmul (f32 acc) + folded BN + ReLU ----
    xb = x_ref[...].reshape(M, Cin).astype(jnp.bfloat16)
    s = jnp.dot(xb, wsq_ref[...], preferred_element_type=jnp.float32)
    s = jnp.maximum(s * ssq + tsq, 0.0)                      # (M, Csq) f32
    sb = s.astype(jnp.bfloat16)                              # cast once; reused by every tap

    # ---- per-pixel (M, 1) edge masks; broadcast across lanes inside jnp.where ----
    yrow = lax.broadcasted_iota(jnp.int32, (NB, H, Wp, 1), 1).reshape(M, 1)
    xcol = lax.broadcasted_iota(jnp.int32, (NB, H, Wp, 1), 2).reshape(M, 1)
    y_ok = [yrow >= 1, None, yrow <= H - 2]                  # dy = -1, 0, +1
    x_ok = [xcol >= 1, None, xcol <= w_valid - 2]            # dx = -1, 0, +1
    masks = []
    for ky in range(3):
        for kx in range(3):
            m = None
            for cond in (y_ok[ky], x_ok[kx]):
                if cond is not None:
                    m = cond if m is None else jnp.logical_and(m, cond)
            masks.append(m)

    # ---- expand3x3 im2col: f32 rolls (XLU) -> bf16 mask + concat -> one matmul ----
    # For tap (ky,kx), source pixel = (y+ky-1, x+kx-1); in flattened row index p that
    # is p + (ky-1)*Wp + (kx-1).  Rolls wrap across image/row boundaries, but the
    # masks zero exactly the conv zero-padding positions (incl. any padded columns).
    zero_b = jnp.zeros((), jnp.bfloat16)
    taps = []
    for ky in range(3):
        for kx in range(3):
            d = (ky - 1) * Wp + (kx - 1)
            # TODO(synk): roll directly in bf16 once packed-sublane rolls with odd
            #             shifts are verified to lower cleanly; for now roll f32.
            t = sb if d == 0 else pltpu.roll(s, (-d) % M, 0).astype(jnp.bfloat16)
            m = masks[ky * 3 + kx]
            if m is not None:
                t = jnp.where(m, t, zero_b)
            taps.append(t)
    imcol = jnp.concatenate(taps, axis=-1)                   # (M, 9*Csq) bf16

    # ---- fused expand matmul: expand1x1 lives in the centre-tap rows of wexp ----
    e = jnp.dot(imcol, wexp_ref[...], preferred_element_type=jnp.float32)  # (M, cout)
    y = jnp.maximum(e * sexp + texp, 0.0)
    out_ref[...] = y.reshape(out_ref.shape).astype(out_ref.dtype)


def fold_bn(gamma, beta, mean, var, conv_bias, eps=1e-5):
    scale = gamma / jnp.sqrt(var + eps)
    shift = beta - scale * mean + scale * conv_bias
    return (scale.reshape(1, -1).astype(jnp.float32),
            shift.reshape(1, -1).astype(jnp.float32))


def _tile_padded_bytes(rows, cols, itemsize):
    """Bytes occupied by a (rows, cols) array after (sublane, lane) tile padding."""
    sub = max(8, 32 // itemsize)      # 8 for f32, 16 for bf16, 32 for int8
    r = -(-rows // sub) * sub
    c = -(-cols // 128) * 128
    return r * c * itemsize


def _per_image_vmem_bytes(H, W, Cin, Csq, cout, io_bytes):
    """Tile-padded per-image VMEM footprint of one grid step (incl. double buffers)."""
    M = H * W
    pb = _tile_padded_bytes
    b = 2 * pb(M, Cin, io_bytes)          # x input block (x2 pipeline buffers)
    b += 2 * pb(M, cout, io_bytes)        # output block (x2 pipeline buffers)
    b += pb(M, Cin, 2)                    # bf16 x
    b += pb(M, Csq, 4) + pb(M, Csq, 2)    # s (f32) + sb (bf16)
    b += 8 * pb(M, Csq, 4)                # rolled f32 taps (worst-case live)
    b += pb(M, 9 * Csq, 2)                # im2col slab (bf16)
    b += 2 * pb(M, cout, 4)               # fused-matmul acc + epilogue f32
    b += 2 * pb(M, 1, 4)                  # (M,1) iotas / masks (lane-padded)
    return b


def _weight_vmem_bytes(Cin, Csq, cout):
    pb = _tile_padded_bytes
    return 2 * (pb(Cin, Csq, 2) + pb(9 * Csq, cout, 2)
                + 2 * pb(1, Csq, 4) + 2 * pb(1, cout, 4))


@functools.partial(jax.jit, static_argnames=("batch_block",))
def fire_forward(x_nhwc, params, batch_block=None):
    """Pallas Fire forward, NHWC in / NHWC out (preferred layout; bf16 I/O supported)."""
    N, H, W, Cin = x_nhwc.shape
    wsq = params["wsq"].astype(jnp.bfloat16)                  # (Cin, Csq)
    Csq = wsq.shape[1]
    Ce1 = params["we1"].shape[1]
    Ce3 = params["we3"].shape[3]
    cout = Ce1 + Ce3

    # Fused expand weights: columns [:Ce1] hold expand1x1 (nonzero only on the
    # centre-tap rows), columns [Ce1:] hold expand3x3 flattened as (ky, kx, c) rows.
    wexp = jnp.zeros((9 * Csq, cout), jnp.float32)
    wexp = wexp.at[4 * Csq:5 * Csq, :Ce1].set(params["we1"])
    wexp = wexp.at[:, Ce1:].set(params["we3"].reshape(9 * Csq, Ce3))
    wexp = wexp.astype(jnp.bfloat16)

    ssq, tsq = fold_bn(params["g_sq"], params["b_sq"], params["m_sq"],
                       params["v_sq"], params["bsq"])
    se1, te1 = fold_bn(params["g_e1"], params["b_e1"], params["m_e1"],
                       params["v_e1"], params["be1"])
    se3, te3 = fold_bn(params["g_e3"], params["b_e3"], params["m_e3"],
                       params["v_e3"], params["be3"])
    sexp = jnp.concatenate([se1, se3], axis=1)                # (1, cout)
    texp = jnp.concatenate([te1, te3], axis=1)

    # Pad W to a multiple of 8 so the in-kernel (NB,H,W,C)->(M,C) reshapes stay
    # tile-aligned (real SqueezeNet W = 55/27/13). Padded columns are masked
    # in-kernel and sliced off below.
    Wp = -(-W // 8) * 8
    if Wp != W:
        x_nhwc = jnp.pad(x_nhwc, ((0, 0), (0, 0), (0, Wp - W), (0, 0)))

    gen = _tpu_generation()
    cfg = _GEN_CONFIG[gen]
    per_img = _per_image_vmem_bytes(H, Wp, Cin, Csq, cout, x_nhwc.dtype.itemsize)
    w_bytes = _weight_vmem_bytes(Cin, Csq, cout)

    if batch_block is None:
        nb = max(1, min(N, (cfg["budget"] - w_bytes) // max(per_img, 1)))
        if N >= cfg["min_steps"]:
            nb = min(nb, max(1, N // cfg["min_steps"]))       # keep >= min_steps grid steps
        while N % nb:
            nb -= 1
        if cfg["prefer_even_steps"] and N >= 2:
            nb_even = nb                                      # v7x: even step count so both
            while nb_even >= 1 and (N % nb_even or (N // nb_even) % 2):
                nb_even -= 1                                  # TensorCores stay balanced
            if nb_even >= 1:
                nb = nb_even
    else:
        nb = int(batch_block)
    assert N % nb == 0, (N, nb)

    step_bytes = per_img * nb + w_bytes
    vmem_limit = None
    if step_bytes > (3 * cfg["scoped"]) // 4:                 # raise scoped VMEM, capped per-gen
        vmem_limit = int(min(cfg["cap"], max(cfg["scoped"], (step_bytes * 3) // 2)))

    kernel = functools.partial(fire_kernel, w_valid=W)
    full = lambda shape: pl.BlockSpec(shape, lambda n: (0,) * len(shape))
    out = pl.pallas_call(
        kernel,
        out_shape=jax.ShapeDtypeStruct((N, H, Wp, cout), x_nhwc.dtype),
        grid_spec=pltpu.PrefetchScalarGridSpec(
            num_scalar_prefetch=0,
            grid=(N // nb,),
            in_specs=[
                pl.BlockSpec((nb, H, Wp, Cin), lambda n: (n, 0, 0, 0)),
                full((Cin, Csq)), full((1, Csq)), full((1, Csq)),
                full((9 * Csq, cout)),
                full((1, cout)), full((1, cout)),
            ],
            out_specs=pl.BlockSpec((nb, H, Wp, cout), lambda n: (n, 0, 0, 0)),
        ),
        compiler_params=pltpu.CompilerParams(
            dimension_semantics=("parallel",),
            vmem_limit_bytes=vmem_limit),
    )(x_nhwc, wsq, ssq, tsq, wexp, sexp, texp)
    if Wp != W:
        out = out[:, :, :W, :]
    return out


@functools.partial(jax.jit, static_argnames=("batch_block",))
def fire_forward_nchw(x_nchw, params, batch_block=None):
    """Interop wrapper matching the PyTorch NCHW layout (prefer the NHWC entry point;
    the two transposes here are extra HBM round trips)."""
    x = jnp.transpose(x_nchw, (0, 2, 3, 1))
    out = fire_forward(x, params, batch_block=batch_block)
    return jnp.transpose(out, (0, 3, 1, 2))


def fire_reference(x_nchw, params, eps=1e-5):
    """Pure-JAX f32 reference (eval-mode BN) for correctness checking."""
    def bn(z, g, b, m, v):
        return (z - m) / jnp.sqrt(v + eps) * g + b

    x = jnp.transpose(x_nchw, (0, 2, 3, 1))
    dn = ("NHWC", "HWIO", "NHWC")
    s = lax.conv_general_dilated(x, params["wsq"][None, None], (1, 1), "VALID",
                                 dimension_numbers=dn) + params["bsq"]
    s = jax.nn.relu(bn(s, params["g_sq"], params["b_sq"], params["m_sq"], params["v_sq"]))
    e1 = lax.conv_general_dilated(s, params["we1"][None, None], (1, 1), "VALID",
                                  dimension_numbers=dn) + params["be1"]
    e1 = jax.nn.relu(bn(e1, params["g_e1"], params["b_e1"], params["m_e1"], params["v_e1"]))
    e3 = lax.conv_general_dilated(s, params["we3"], (1, 1), ((1, 1), (1, 1)),
                                  dimension_numbers=dn) + params["be3"]
    e3 = jax.nn.relu(bn(e3, params["g_e3"], params["b_e3"], params["m_e3"], params["v_e3"]))
    return jnp.transpose(jnp.concatenate([e1, e3], axis=-1), (0, 3, 1, 2))


def make_params(key, inplanes, squeeze_planes, expand1x1_planes, expand3x3_planes):
    ks = jax.random.split(key, 16)
    u = lambda k, shape, lim: jax.random.uniform(k, shape, jnp.float32, -lim, lim)

    def xavier(k, fan_in, fan_out, shape):
        lim = (6.0 / (fan_in + fan_out)) ** 0.5
        return u(k, shape, lim)

    p = {}
    # conv weights, stored ready for channels-last matmul / HWIO conv
    p["wsq"] = xavier(ks[0], inplanes, squeeze_planes, (inplanes, squeeze_planes))
    p["bsq"] = u(ks[1], (squeeze_planes,), 0.1)
    p["we1"] = xavier(ks[2], squeeze_planes, expand1x1_planes,
                      (squeeze_planes, expand1x1_planes))
    p["be1"] = u(ks[3], (expand1x1_planes,), 0.1)
    p["we3"] = xavier(ks[4], squeeze_planes * 9, expand3x3_planes * 9,
                      (3, 3, squeeze_planes, expand3x3_planes))
    p["be3"] = u(ks[5], (expand3x3_planes,), 0.1)
    # BatchNorm (eval-mode) params: gamma, beta, running_mean, running_var
    for i, (tag, c) in enumerate([("sq", squeeze_planes),
                                  ("e1", expand1x1_planes),
                                  ("e3", expand3x3_planes)]):
        kk = jax.random.split(ks[6 + i], 4)
        p[f"g_{tag}"] = 1.0 + 0.2 * jax.random.normal(kk[0], (c,), jnp.float32)
        p[f"b_{tag}"] = 0.1 * jax.random.normal(kk[1], (c,), jnp.float32)
        p[f"m_{tag}"] = 0.1 * jax.random.normal(kk[2], (c,), jnp.float32)
        p[f"v_{tag}"] = 0.5 + jax.random.uniform(kk[3], (c,), jnp.float32)
    return p


if __name__ == "__main__":
    # Fire(inplanes=8, squeeze_planes=8, expand1x1_planes=16, expand3x3_planes=16)
    N, Cin, H, W = 2, 8, 16, 16
    Csq, Ce1, Ce3 = 8, 16, 16

    key = jax.random.PRNGKey(0)
    kx, kp = jax.random.split(key)
    x = jax.random.normal(kx, (N, Cin, H, W), jnp.float32)
    params = make_params(kp, Cin, Csq, Ce1, Ce3)

    out = jax.block_until_ready(fire_forward_nchw(x, params))
    assert out.shape == (N, Ce1 + Ce3, H, W), out.shape

    ref = jax.block_until_ready(fire_reference(x, params))
    err = float(jnp.max(jnp.abs(out - ref)))
    scale = float(jnp.max(jnp.abs(ref)))
    # bf16 MXU inputs (f32 accumulation) -> tolerance relaxed vs pure-f32 math.
    assert err <= 0.03 * scale + 0.03, f"max abs err {err} (ref max {scale})"

    print("KERNEL_OK")
</pallas_src>

<mosaic_0001>
module attributes {stable_mosaic.version = 11 : i64} {
  func.func @fire_kernel(%arg0: i32, %arg1: memref<1x16x16x8xf32, #tpu.memory_space<vmem>>, %arg2: memref<8x8xbf16, #tpu.memory_space<vmem>>, %arg3: memref<1x8xf32, #tpu.memory_space<vmem>>, %arg4: memref<1x8xf32, #tpu.memory_space<vmem>>, %arg5: memref<72x32xbf16, #tpu.memory_space<vmem>>, %arg6: memref<1x32xf32, #tpu.memory_space<vmem>>, %arg7: memref<1x32xf32, #tpu.memory_space<vmem>>, %arg8: memref<1x16x16x32xf32, #tpu.memory_space<vmem>>) attributes {dimension_semantics = [#tpu.dimension_semantics<parallel>], iteration_bounds = array<i64: 2>, scalar_prefetch = 0 : i64, scratch_operands = 0 : i64, tpu.core_type = #tpu.core_type<tc>, window_params = [{transform_indices = @transform_0, window_bounds = array<i64: 1, 16, 16, 8>}, {pipeline_mode = #tpu.pipeline_mode<synchronous>, transform_indices = @transform_1, window_bounds = array<i64: 8, 8>}, {pipeline_mode = #tpu.pipeline_mode<synchronous>, transform_indices = @transform_2, window_bounds = array<i64: 1, 8>}, {pipeline_mode = #tpu.pipeline_mode<synchronous>, transform_indices = @transform_3, window_bounds = array<i64: 1, 8>}, {pipeline_mode = #tpu.pipeline_mode<synchronous>, transform_indices = @transform_4, window_bounds = array<i64: 72, 32>}, {pipeline_mode = #tpu.pipeline_mode<synchronous>, transform_indices = @transform_5, window_bounds = array<i64: 1, 32>}, {pipeline_mode = #tpu.pipeline_mode<synchronous>, transform_indices = @transform_6, window_bounds = array<i64: 1, 32>}, {transform_indices = @transform_7, window_bounds = array<i64: 1, 16, 16, 32>}]} {
    %c0 = arith.constant 0 : index
    %c0_0 = arith.constant 0 : index
    %0 = vector.load %arg3[%c0, %c0_0] : memref<1x8xf32, #tpu.memory_space<vmem>>, vector<1x8xf32>
    %c0_1 = arith.constant 0 : index
    %c0_2 = arith.constant 0 : index
    %1 = vector.load %arg4[%c0_1, %c0_2] : memref<1x8xf32, #tpu.memory_space<vmem>>, vector<1x8xf32>
    %c0_3 = arith.constant 0 : index
    %c0_4 = arith.constant 0 : index
    %2 = vector.load %arg6[%c0_3, %c0_4] : memref<1x32xf32, #tpu.memory_space<vmem>>, vector<1x32xf32>
    %c0_5 = arith.constant 0 : index
    %c0_6 = arith.constant 0 : index
    %3 = vector.load %arg7[%c0_5, %c0_6] : memref<1x32xf32, #tpu.memory_space<vmem>>, vector<1x32xf32>
    %c0_7 = arith.constant 0 : index
    %c0_8 = arith.constant 0 : index
    %c0_9 = arith.constant 0 : index
    %c0_10 = arith.constant 0 : index
    %4 = vector.load %arg1[%c0_7, %c0_8, %c0_9, %c0_10] : memref<1x16x16x8xf32, #tpu.memory_space<vmem>>, vector<1x16x16x8xf32>
    %5 = vector.shape_cast %4 : vector<1x16x16x8xf32> to vector<256x8xf32>
    %6 = arith.truncf %5 : vector<256x8xf32> to vector<256x8xbf16>
    %c0_11 = arith.constant 0 : index
    %c0_12 = arith.constant 0 : index
    %7 = vector.load %arg2[%c0_11, %c0_12] : memref<8x8xbf16, #tpu.memory_space<vmem>>, vector<8x8xbf16>
    %cst = arith.constant dense<0.000000e+00> : vector<256x8xf32>
    %8 = tpu.matmul %6, %7, %cst {dimension_numbers = #tpu.dot_dimension_numbers<[1], [0], [0], [1], [0, 0, 1, 1], [], []>} : vector<256x8xbf16>, vector<8x8xbf16>, vector<256x8xf32> -> vector<256x8xf32>
    %9 = vector.broadcast %0 : vector<1x8xf32> to vector<256x8xf32>
    %10 = arith.mulf %8, %9 : vector<256x8xf32>
    %11 = vector.broadcast %1 : vector<1x8xf32> to vector<256x8xf32>
    %12 = arith.addf %10, %11 : vector<256x8xf32>
    %cst_13 = arith.constant 0.000000e+00 : f32
    %13 = vector.broadcast %cst_13 : f32 to vector<256x8xf32>
    %14 = arith.maximumf %12, %13 : vector<256x8xf32>
    %15 = arith.truncf %14 : vector<256x8xf32> to vector<256x8xbf16>
    %16 = tpu.iota {dimensions = array<i32: 1>} : vector<1x16x16x1xi32>
    %17 = vector.shape_cast %16 : vector<1x16x16x1xi32> to vector<256x1xi32>
    %18 = tpu.iota {dimensions = array<i32: 2>} : vector<1x16x16x1xi32>
    %19 = vector.shape_cast %18 : vector<1x16x16x1xi32> to vector<256x1xi32>
    %c1_i32 = arith.constant 1 : i32
    %20 = vector.broadcast %c1_i32 : i32 to vector<256x1xi32>
    %21 = arith.cmpi sge, %17, %20 : vector<256x1xi32>
    %c14_i32 = arith.constant 14 : i32
    %22 = vector.broadcast %c14_i32 : i32 to vector<256x1xi32>
    %23 = arith.cmpi sle, %17, %22 : vector<256x1xi32>
    %c1_i32_14 = arith.constant 1 : i32
    %24 = vector.broadcast %c1_i32_14 : i32 to vector<256x1xi32>
    %25 = arith.cmpi sge, %19, %24 : vector<256x1xi32>
    %c14_i32_15 = arith.constant 14 : i32
    %26 = vector.broadcast %c14_i32_15 : i32 to vector<256x1xi32>
    %27 = arith.cmpi sle, %19, %26 : vector<256x1xi32>
    %28 = arith.andi %21, %25 : vector<256x1xi1>
    %29 = arith.andi %21, %27 : vector<256x1xi1>
    %30 = arith.andi %23, %25 : vector<256x1xi1>
    %31 = arith.andi %23, %27 : vector<256x1xi1>
    %c17_i32 = arith.constant 17 : i32
    %32 = tpu.dynamic_rotate %14 by %c17_i32 dim 0 : vector<256x8xf32>, i32 -> vector<256x8xf32>
    %33 = arith.truncf %32 : vector<256x8xf32> to vector<256x8xbf16>
    %cst_16 = arith.constant 0.000000e+00 : bf16
    %34 = vector.shape_cast %28 : vector<256x1xi1> to vector<256x1xi1>
    %35 = vector.broadcast %34 : vector<256x1xi1> to vector<256x8xi1>
    %36 = vector.broadcast %cst_16 : bf16 to vector<256x8xbf16>
    %37 = arith.select %35, %33, %36 : vector<256x8xi1>, vector<256x8xbf16>
    %c16_i32 = arith.constant 16 : i32
    %38 = tpu.dynamic_rotate %14 by %c16_i32 dim 0 : vector<256x8xf32>, i32 -> vector<256x8xf32>
    %39 = arith.truncf %38 : vector<256x8xf32> to vector<256x8xbf16>
    %cst_17 = arith.constant 0.000000e+00 : bf16
    %40 = vector.shape_cast %21 : vector<256x1xi1> to vector<256x1xi1>
    %41 = vector.broadcast %40 : vector<256x1xi1> to vector<256x8xi1>
    %42 = vector.broadcast %cst_17 : bf16 to vector<256x8xbf16>
    %43 = arith.select %41, %39, %42 : vector<256x8xi1>, vector<256x8xbf16>
    %c15_i32 = arith.constant 15 : i32
    %44 = tpu.dynamic_rotate %14 by %c15_i32 dim 0 : vector<256x8xf32>, i32 -> vector<256x8xf32>
    %45 = arith.truncf %44 : vector<256x8xf32> to vector<256x8xbf16>
    %cst_18 = arith.constant 0.000000e+00 : bf16
    %46 = vector.shape_cast %29 : vector<256x1xi1> to vector<256x1xi1>
    %47 = vector.broadcast %46 : vector<256x1xi1> to vector<256x8xi1>
    %48 = vector.broadcast %cst_18 : bf16 to vector<256x8xbf16>
    %49 = arith.select %47, %45, %48 : vector<256x8xi1>, vector<256x8xbf16>
    %c1_i32_19 = arith.constant 1 : i32
    %50 = tpu.dynamic_rotate %14 by %c1_i32_19 dim 0 : vector<256x8xf32>, i32 -> vector<256x8xf32>
    %51 = arith.truncf %50 : vector<256x8xf32> to vector<256x8xbf16>
    %cst_20 = arith.constant 0.000000e+00 : bf16
    %52 = vector.shape_cast %25 : vector<256x1xi1> to vector<256x1xi1>
    %53 = vector.broadcast %52 : vector<256x1xi1> to vector<256x8xi1>
    %54 = vector.broadcast %cst_20 : bf16 to vector<256x8xbf16>
    %55 = arith.select %53, %51, %54 : vector<256x8xi1>, vector<256x8xbf16>
    %c255_i32 = arith.constant 255 : i32
    %56 = tpu.dynamic_rotate %14 by %c255_i32 dim 0 : vector<256x8xf32>, i32 -> vector<256x8xf32>
    %57 = arith.truncf %56 : vector<256x8xf32> to vector<256x8xbf16>
    %cst_21 = arith.constant 0.000000e+00 : bf16
    %58 = vector.shape_cast %27 : vector<256x1xi1> to vector<256x1xi1>
    %59 = vector.broadcast %58 : vector<256x1xi1> to vector<256x8xi1>
    %60 = vector.broadcast %cst_21 : bf16 to vector<256x8xbf16>
    %61 = arith.select %59, %57, %60 : vector<256x8xi1>, vector<256x8xbf16>
    %c241_i32 = arith.constant 241 : i32
    %62 = tpu.dynamic_rotate %14 by %c241_i32 dim 0 : vector<256x8xf32>, i32 -> vector<256x8xf32>
    %63 = arith.truncf %62 : vector<256x8xf32> to vector<256x8xbf16>
    %cst_22 = arith.constant 0.000000e+00 : bf16
    %64 = vector.shape_cast %30 : vector<256x1xi1> to vector<256x1xi1>
    %65 = vector.broadcast %64 : vector<256x1xi1> to vector<256x8xi1>
    %66 = vector.broadcast %cst_22 : bf16 to vector<256x8xbf16>
    %67 = arith.select %65, %63, %66 : vector<256x8xi1>, vector<256x8xbf16>
    %c240_i32 = arith.constant 240 : i32
    %68 = tpu.dynamic_rotate %14 by %c240_i32 dim 0 : vector<256x8xf32>, i32 -> vector<256x8xf32>
    %69 = arith.truncf %68 : vector<256x8xf32> to vector<256x8xbf16>
    %cst_23 = arith.constant 0.000000e+00 : bf16
    %70 = vector.shape_cast %23 : vector<256x1xi1> to vector<256x1xi1>
    %71 = vector.broadcast %70 : vector<256x1xi1> to vector<256x8xi1>
    %72 = vector.broadcast %cst_23 : bf16 to vector<256x8xbf16>
    %73 = arith.select %71, %69, %72 : vector<256x8xi1>, vector<256x8xbf16>
    %c239_i32 = arith.constant 239 : i32
    %74 = tpu.dynamic_rotate %14 by %c239_i32 dim 0 : vector<256x8xf32>, i32 -> vector<256x8xf32>
    %75 = arith.truncf %74 : vector<256x8xf32> to vector<256x8xbf16>
    %cst_24 = arith.constant 0.000000e+00 : bf16
    %76 = vector.shape_cast %31 : vector<256x1xi1> to vector<256x1xi1>
    %77 = vector.broadcast %76 : vector<256x1xi1> to vector<256x8xi1>
    %78 = vector.broadcast %cst_24 : bf16 to vector<256x8xbf16>
    %79 = arith.select %77, %75, %78 : vector<256x8xi1>, vector<256x8xbf16>
    %80 = tpu.concatenate %37, %43, %49, %55, %15, %61, %67, %73, %79 in 1 : vector<256x8xbf16>, vector<256x8xbf16>, vector<256x8xbf16>, vector<256x8xbf16>, vector<256x8xbf16>, vector<256x8xbf16>, vector<256x8xbf16>, vector<256x8xbf16>, vector<256x8xbf16> -> vector<256x72xbf16>
    %c0_25 = arith.constant 0 : index
    %c0_26 = arith.constant 0 : index
    %81 = vector.load %arg5[%c0_25, %c0_26] : memref<72x32xbf16, #tpu.memory_space<vmem>>, vector<72x32xbf16>
    %cst_27 = arith.constant dense<0.000000e+00> : vector<256x32xf32>
    %82 = tpu.matmul %80, %81, %cst_27 {dimension_numbers = #tpu.dot_dimension_numbers<[1], [0], [0], [1], [0, 0, 1, 1], [], []>} : vector<256x72xbf16>, vector<72x32xbf16>, vector<256x32xf32> -> vector<256x32xf32>
    %83 = vector.broadcast %2 : vector<1x32xf32> to vector<256x32xf32>
    %84 = arith.mulf %82, %83 : vector<256x32xf32>
    %85 = vector.broadcast %3 : vector<1x32xf32> to vector<256x32xf32>
    %86 = arith.addf %84, %85 : vector<256x32xf32>
    %cst_28 = arith.constant 0.000000e+00 : f32
    %87 = vector.broadcast %cst_28 : f32 to vector<256x32xf32>
    %88 = arith.maximumf %86, %87 : vector<256x32xf32>
    %89 = vector.shape_cast %88 : vector<256x32xf32> to vector<1x16x16x32xf32>
    %c0_29 = arith.constant 0 : index
    %c0_30 = arith.constant 0 : index
    %c0_31 = arith.constant 0 : index
    %c0_32 = arith.constant 0 : index
    %90 = vector.load %arg8[%c0_29, %c0_30, %c0_31, %c0_32] : memref<1x16x16x32xf32, #tpu.memory_space<vmem>>, vector<1x16x16x32xf32>
    tpu.vector_store %arg8[%c0_29, %c0_30, %c0_31, %c0_32], %89 {strides = array<i32>} : memref<1x16x16x32xf32, #tpu.memory_space<vmem>>, vector<1x16x16x32xf32>,
    return
  }
  func.func @transform_0(%arg0: i32) -> (i32, i32, i32, i32) {
    %c0_i32 = arith.constant 0 : i32
    %c0_i32_0 = arith.constant 0 : i32
    %c0_i32_1 = arith.constant 0 : i32
    %c0_i32_2 = arith.constant 0 : i32
    return %arg0, %c0_i32, %c0_i32_0, %c0_i32_1 : i32, i32, i32, i32
  }
  func.func @transform_1(%arg0: i32) -> (i32, i32) {
    %c0_i32 = arith.constant 0 : i32
    %c0_i32_0 = arith.constant 0 : i32
    %c0_i32_1 = arith.constant 0 : i32
    return %c0_i32, %c0_i32_0 : i32, i32
  }
  func.func @transform_2(%arg0: i32) -> (i32, i32) {
    %c0_i32 = arith.constant 0 : i32
    %c0_i32_0 = arith.constant 0 : i32
    %c0_i32_1 = arith.constant 0 : i32
    return %c0_i32, %c0_i32_0 : i32, i32
  }
  func.func @transform_3(%arg0: i32) -> (i32, i32) {
    %c0_i32 = arith.constant 0 : i32
    %c0_i32_0 = arith.constant 0 : i32
    %c0_i32_1 = arith.constant 0 : i32
    return %c0_i32, %c0_i32_0 : i32, i32
  }
  func.func @transform_4(%arg0: i32) -> (i32, i32) {
    %c0_i32 = arith.constant 0 : i32
    %c0_i32_0 = arith.constant 0 : i32
    %c0_i32_1 = arith.constant 0 : i32
    return %c0_i32, %c0_i32_0 : i32, i32
  }
  func.func @transform_5(%arg0: i32) -> (i32, i32) {
    %c0_i32 = arith.constant 0 : i32
    %c0_i32_0 = arith.constant 0 : i32
    %c0_i32_1 = arith.constant 0 : i32
    return %c0_i32, %c0_i32_0 : i32, i32
  }
  func.func @transform_6(%arg0: i32) -> (i32, i32) {
    %c0_i32 = arith.constant 0 : i32
    %c0_i32_0 = arith.constant 0 : i32
    %c0_i32_1 = arith.constant 0 : i32
    return %c0_i32, %c0_i32_0 : i32, i32
  }
  func.func @transform_7(%arg0: i32) -> (i32, i32, i32, i32) {
    %c0_i32 = arith.constant 0 : i32
    %c0_i32_0 = arith.constant 0 : i32
    %c0_i32_1 = arith.constant 0 : i32
    %c0_i32_2 = arith.constant 0 : i32
    return %arg0, %c0_i32, %c0_i32_0, %c0_i32_1 : i32, i32, i32, i32
  }
}

</mosaic_0001>

<bundles_post_ra>
// kernel: fire_forward.1
= control target key start
LH: loop header
LB: loop body
LE: loop exit
PB: predicated region body
PF: predicated region fallthrough
CT: control target
= control target key end

     0   :  { %12 = vsyncpa [#allocation3], 0  ;;  %s4379_s0 = inlined_call_operand.vmem [shape: f32[2,16,16,8], index: 0, kind: input, shape index: {}]   ;;  %s4380_s1 = inlined_call_operand.vmem [shape: bf16[8,8], index: 1, kind: input, shape index: {}]   ;;  %s4381_s2 = inlined_call_operand.vmem [shape: f32[1,8], index: 2, kind: input, shape index: {}]   ;;  %s4382_s3 = inlined_call_operand.vmem [shape: f32[1,8], index: 3, kind: input, shape index: {}]   ;;  %s4383_s4 = inlined_call_operand.vmem [shape: bf16[72,32], index: 4, kind: input, shape index: {}]   ;;  %s4384_s5 = inlined_call_operand.vmem [shape: f32[1,32], index: 5, kind: input, shape index: {}]   ;;  %s4385_s6 = inlined_call_operand.vmem [shape: f32[1,32], index: 6, kind: input, shape index: {}]   ;;  %s4386_s7 = inlined_call_operand.hbm [shape: f32[2,16,16,32], index: 7, kind: output, shape index: {}]  }
   0x1   :  { %14 = vsyncpa [#allocation3 + $0x1], 0  ;;  %s2431_s24 = smov 0   ;;  %s2433_s25 = smov 0  }
   0x2   :  { %s2435_s26 = smov 0   ;;  %s2437_s27 = smov 0  }
   0x3 LB: > { %s2452_s28 = sadd.s32 4294967295, %s2378_s27   ;;  %s2188_s29 = sadd.s32 4294967294, %s2378_s27   ;;  %s2378_s27 = sphi %s2437_s27, %s4556_s27   ;;  %s2374_s26 = sphi %s2435_s26, %s4555_s26   ;;  %s2370_s25 = sphi %s2433_s25, %s4554_s25   ;;  %s2366_s24 = sphi %s2431_s24, %s4553_s24  }
   0x4   : > { %s2456_s30 = sadd.s32 1, %s2378_s27   ;;  %s179_s8 = sadd.s32 1, %s2374_s26 }
   0x5   : > { %s176_s9 = ssub.s32 %s2378_s27, %s2456_s30  ;;  %p189_p0 = scmp.ne.s32.totalorder %s2374_s26, %s2370_s25 }
   0x6   : > { %p177_p1 = scmp.eq.s32.totalorder %s176_s9, 0  ;;  %p190_p2 = scmp.eq.s32.totalorder %s2452_s28, 1 }
   0x7   : > { %p195_p3 = scmp.ne.s32.totalorder %s2370_s25, %s2366_s24  ;;  %p196_p4 = scmp.eq.s32.totalorder %s2188_s29, 1 }
   0x8   : > { %s2467_s10 = scalar_select %p177_p1, %s2374_s26, %s179_s8  }
   0x9   : > { %p2469_p5 = por %p190_p2, %p189_p0  ;;  %p2473_p6 = por %p196_p4, %p195_p3 }
   0xa   : > { %p2191_p7 = scmp.ge.s32.totalorder %s2378_s27, 1  ;;  %p240_p8 = scmp.lt.s32.totalorder %s2378_s27, 3 }
   0xc   : > { %p241_p9 = pnand %p2191_p7, %p240_p8 }
   0xe   : > { %244 = sbr.rel (%p241_p9) target bundleno = 787 (0x313), region = 48 }
  0x13   : > { %v330_v0 = vld [vmem:[%s4380_s1] sm:$0xf]  ;;  %vm380_vm0 = vcmask 1043456   ;;  %p272_p10 = scmp.lt.s32.totalorder %s2452_s28, 1  ;;  %vm331_vm1 = vcmask 64512   ;;  %v607_v55 = vlaneseq  ;;  %vm2380_vm2 = vmmov 1  }
  0x14   : > { %v382_v1 = vsel %vm380_vm0, %v330_v0, 0  ;;  %v2540_v49 = vld [vmem:[%s4381_s2] ss:$0 sm:$0xff]  ;;  %vm2562_vm3 = vmpackc.low %vm2380_vm2, %vm2380_vm2  ;;  %s2381_s29 = smov 32   ;;  %s2382_s8 = smov 8   ;;  %vm2389_vm10 = vmmov 0  }
  0x15   : > { %391 = vmatpush.bf16.msra.mxu0 %v382_v1  ;;  %2254 = vmatpush.bf16.msra.mxu3 %v382_v1  ;;  %s273_s15 = scalar_select %p272_p10, %s2452_s28, 1  ;;  %v2545_v50 = vld [vmem:[%s4382_s3] ss:$0 sm:$0xff]  ;;  %v2555_v62 = vshrl.u32 %v607_v55, 7  ;;  %vm2805_vm11 = vmpackc.low %vm2389_vm10, %vm2389_vm10  ;;  %vm1584_vm12 = vcmask 130048   ;;  %vm1617_vm13 = vcmask 195584  }
  0x16   : > { %s2383_s9 = smov 16   ;;  %s2384_s13 = smov 40   ;;  %vm1650_vm14 = vcmask 261120   ;;  %vm1683_vm15 = vcmask 326656   ;;  %vm1716_vm2 = vcmask 392192  }
  0x17   : > { %s2248_s16 = sshll.u32 %s273_s15, 8  ;;  %vm646_vm4 = vcmp.lt.s32.totalorder %v2555_v62, 1  ;;  %vm815_vm5 = vcmp.lt.s32.totalorder %v2555_v62, 7  ;;  %vm610_vm8 = vcmp.ge.s32.totalorder %v2555_v62, 1  ;;  %s2385_s14 = smov 48  }
  0x18   : > { %s2488_s19 = scalar_lea.vmem %s4379_s0, %s2248_s16  ;;  %vm2647_vm9 = vmpackc.low %vm610_vm8, %vm610_vm8  ;;  %s2386_s15 = smov 56  }
  0x19   : > { %v282_v2 = vld [vmem:[%s2488_s19] sm:$0xff]  ;;  %v283_v3 = vld [vmem:[%s2488_s19 + $0x8] sm:$0xff]  ;;  %v300_v4 = vld [vmem:[%s2488_s19 + $0x90] sm:$0xff]  ;;  %s2387_s16 = smov 24   ;;  %s2388_s17 = smov 64  }
  0x1a   : > { %v314_v5 = vpack.c.bf16 %v283_v3, %v282_v2  ;;  %v301_v6 = vld [vmem:[%s2488_s19 + $0x98] sm:$0xff]  ;;  %v284_v8 = vld [vmem:[%s2488_s19 + $0x10] sm:$0xff]  ;;  %v302_v10 = vld [vmem:[%s2488_s19 + $0xa0] sm:$0xff]  ;;  %s2253_s20 = sshll.u32 %s2452_s28, 8 }
  0x1b   : > { %v323_v7 = vpack.c.bf16 %v301_v6, %v300_v4  ;;  %v285_v9 = vld [vmem:[%s2488_s19 + $0x18] sm:$0xff]  ;;  %v303_v11 = vld [vmem:[%s2488_s19 + $0xa8] sm:$0xff]  ;;  %v286_v14 = vld [vmem:[%s2488_s19 + $0x20] sm:$0xff]  ;;  %s2122_s23 = scalar_lea.hbm %s4386_s7, %s2253_s20 }
  0x1c   : > { %2195 = vmatmul.msk.bf16.vlgmr.msra.gmra.mxu0 %vm331_vm1, %v314_v5  ;;  %v315_v12 = vpack.c.bf16 %v285_v9, %v284_v8  ;;  %v324_v13 = vpack.c.bf16 %v303_v11, %v302_v10  ;;  %v287_v15 = vld [vmem:[%s2488_s19 + $0x28] sm:$0xff]  ;;  %v304_v16 = vld [vmem:[%s2488_s19 + $0xb0] sm:$0xff]  ;;  %v305_v17 = vld [vmem:[%s2488_s19 + $0xb8] sm:$0xff]  ;;  %s2125_s18 = sshll.u32 %s2122_s23, 4  ;;  %s2126_s18 = int_to_ptr.hbm [resolvable:$true] %s2125_s18 }
  0x1d   : > { %2204 = vmatmul.msk.bf16.vlgmr.msra.gmra.mxu3 %vm331_vm1, %v323_v7  ;;  %v316_v18 = vpack.c.bf16 %v287_v15, %v286_v14  ;;  %v325_v19 = vpack.c.bf16 %v305_v17, %v304_v16  ;;  %v288_v20 = vld [vmem:[%s2488_s19 + $0x30] sm:$0xff]  ;;  %v289_v21 = vld [vmem:[%s2488_s19 + $0x38] sm:$0xff]  ;;  %v306_v22 = vld [vmem:[%s2488_s19 + $0xc0] sm:$0xff] }
  0x1e   : > { %v307_v23 = vld [vmem:[%s2488_s19 + $0xc8] sm:$0xff]  ;;  %v317_v24 = vpack.c.bf16 %v289_v21, %v288_v20  ;;  %v290_v26 = vld [vmem:[%s2488_s19 + $0x40] sm:$0xff]  ;;  %v308_v28 = vld [vmem:[%s2488_s19 + $0xd0] sm:$0xff] }
  0x1f   : > { %v326_v25 = vpack.c.bf16 %v307_v23, %v306_v22  ;;  %v291_v27 = vld [vmem:[%s2488_s19 + $0x48] sm:$0xff]  ;;  %v309_v29 = vld [vmem:[%s2488_s19 + $0xd8] sm:$0xff]  ;;  %v292_v32 = vld [vmem:[%s2488_s19 + $0x50] sm:$0xff] }
  0x20   : > { %v318_v30 = vpack.c.bf16 %v291_v27, %v290_v26  ;;  %v327_v31 = vpack.c.bf16 %v309_v29, %v308_v28  ;;  %v293_v33 = vld [vmem:[%s2488_s19 + $0x58] sm:$0xff]  ;;  %v310_v34 = vld [vmem:[%s2488_s19 + $0xe0] sm:$0xff]  ;;  %v311_v35 = vld [vmem:[%s2488_s19 + $0xe8] sm:$0xff] }
  0x21   : > { %v319_v36 = vpack.c.bf16 %v293_v33, %v292_v32  ;;  %v328_v37 = vpack.c.bf16 %v311_v35, %v310_v34  ;;  %v294_v38 = vld [vmem:[%s2488_s19 + $0x60] sm:$0xff]  ;;  %v295_v39 = vld [vmem:[%s2488_s19 + $0x68] sm:$0xff]  ;;  %v312_v40 = vld [vmem:[%s2488_s19 + $0xf0] sm:$0xff] }
  0x22   : > { %v313_v41 = vld [vmem:[%s2488_s19 + $0xf8] sm:$0xff]  ;;  %v320_v42 = vpack.c.bf16 %v295_v39, %v294_v38  ;;  %v296_v44 = vld [vmem:[%s2488_s19 + $0x70] sm:$0xff]  ;;  %v298_v47 = vld [vmem:[%s2488_s19 + $0x80] sm:$0xff] }
  0x23   : > { %v329_v43 = vpack.c.bf16 %v313_v41, %v312_v40  ;;  %v297_v45 = vld [vmem:[%s2488_s19 + $0x78] sm:$0xff]  ;;  %v299_v48 = vld [vmem:[%s2488_s19 + $0x88] sm:$0xff] }
  0x24   : > { %v321_v46 = vpack.c.bf16 %v297_v45, %v296_v44  ;;  %v322_v51 = vpack.c.bf16 %v299_v48, %v298_v47 }
  0x2c   : > { %2196 = vmatmul.msk.bf16.gmra.mxu0 %vm331_vm1, %v315_v12 }
  0x2d   : > { %2205 = vmatmul.msk.bf16.gmra.mxu3 %vm331_vm1, %v324_v13  ;;  %v609_v13 = vadd.s32 8, %v2555_v62 }
  0x2f   : > { %vm613_vm6 = vcmp.le.s32.totalorder %v609_v13, 14 }
  0x30   : > { %vm2617_vm7 = vmpackc.low %vm613_vm6, %vm613_vm6 }
  0x3c   : > { %2197 = vmatmul.msk.bf16.gmra.mxu0 %vm331_vm1, %v316_v18 }
  0x3d   : > { %2206 = vmatmul.msk.bf16.gmra.mxu3 %vm331_vm1, %v325_v19 }
  0x4c   : > { %2198 = vmatmul.msk.bf16.gmra.mxu0 %vm331_vm1, %v317_v24 }
  0x4d   : > { %2207 = vmatmul.msk.bf16.gmra.mxu3 %vm331_vm1, %v326_v25 }
  0x5c   : > { %2199 = vmatmul.msk.bf16.gmra.mxu0 %vm331_vm1, %v318_v30 }
  0x5d   : > { %2208 = vmatmul.msk.bf16.gmra.mxu3 %vm331_vm1, %v327_v31 }
  0x6c   : > { %2200 = vmatmul.msk.bf16.gmra.mxu0 %vm331_vm1, %v319_v36 }
  0x6d   : > { %2209 = vmatmul.msk.bf16.gmra.mxu3 %vm331_vm1, %v328_v37 }
  0x7c   : > { %2201 = vmatmul.msk.bf16.gmra.mxu0 %vm331_vm1, %v320_v42 }
  0x7d   : > { %2210 = vmatmul.msk.bf16.gmra.mxu3 %vm331_vm1, %v329_v43 }
  0x8c   : > { %2202 = vmatmul.msk.bf16.gmra.mxu0 %vm331_vm1, %v321_v46 }
  0x99   : > { %v393_v52 = vpop.f32.mrf.mxu0 }
  0x9a   : > { %v476_v53 = vmul.f32 %v2540_v49, %v393_v52 }
  0x9c   : > { %v511_v54 = vadd.f32 %v2545_v50, %v476_v53  ;;  %2203 = vmatmul.msk.bf16.gmra.mxu0 %vm331_vm1, %v322_v51 }
  0x9e   : > { %v2550_v56 = vmax.f32 %v511_v54, 0.0 }
  0xa0   : > { %v438_v57 = vpop.f32.mrf.mxu3  ;;  %v2559_v63 = vpack.c.bf16 %v2550_v56, %v2550_v56  ;;  %v614_v9 = vrot.slane %v2550_v56, 7  ;;  %v4388_v10 = vrot.slane %v2550_v56, 1 }
  0xa1   : > { %v494_v58 = vmul.f32 %v2540_v49, %v438_v57  ;;  %v395_v59 = vpop.f32.mrf.mxu0 }
  0xa2   : > { %v477_v60 = vmul.f32 %v2540_v49, %v395_v59  ;;  %4419 = vst [vmem:[#allocation5_spill] sm:$0xff] %v2559_v63  ;;  %v753_v8 = vsel %vm2562_vm3, %v2559_v63, 0  ;;  %v1303_v15 = vunpack.c.l.b16 %v2559_v63 }
  0xa3   : > { %v529_v61 = vadd.f32 %v2545_v50, %v494_v58  ;;  %v1044_v20 = vunpack.c.l.b16 %v753_v8 }
  0xa4   : > { %v512_v0 = vadd.f32 %v2545_v50, %v477_v60 }
  0xa5   : > { %v2566_v3 = vmax.f32 %v529_v61, 0.0 }
  0xa6   : > { %v544_v2 = vmax.f32 %v512_v0, 0.0 }
  0xa7   : > { %v593_v18 = vpack.c.bf16 %v2566_v3, %v2566_v3  ;;  %v4387_v57 = vrot.slane %v2566_v3, 1 }
  0xa8   : > { %v2570_v4 = vpack.c.bf16 %v544_v2, %v544_v2  ;;  %v615_v5 = vrot.slane %v544_v2, 7  ;;  %v784_v6 = vrot.slane %v544_v2, 1  ;;  %v440_v7 = vpop.f32.mrf.mxu3 }
  0xa9   : > { %v495_v11 = vmul.f32 %v2540_v49, %v440_v7  ;;  %v398_v12 = vpop.f32.mrf.mxu0  ;;  %v1321_v30 = vunpack.c.l.b16 %v593_v18  ;;  %v771_v46 = vsel %vm2562_vm3, %v593_v18, 0 }
  0xaa   : > { %4422 = vst [vmem:[#allocation6_spill] sm:$0xff] %v2570_v4  ;;  %v478_v14 = vmul.f32 %v2540_v49, %v398_v12  ;;  %v1304_v16 = vunpack.c.l.b16 %v2570_v4  ;;  %v754_v17 = vsel %vm2562_vm3, %v2570_v4, 0  ;;  %v846_v24 = vsel %vm815_vm5, %v4388_v10, %v784_v6 }
  0xab   : > { %v530_v19 = vadd.f32 %v2545_v50, %v495_v11  ;;  %v1045_v21 = vunpack.c.l.b16 %v754_v17  ;;  %v2597_v25 = vsel %vm646_vm4, %v614_v9, %v615_v5  ;;  %v2607_v31 = vpack.c.bf16 %v846_v24, %v846_v24 }
  0xac   : > { %v513_v22 = vadd.f32 %v2545_v50, %v478_v14  ;;  %v1335_v23 = vpack.c.b16 %v1304_v16, %v1303_v15  ;;  %v1062_v59 = vunpack.c.l.b16 %v771_v46 }
  0xad   : > { %v2599_v26 = vmax.f32 %v530_v19, 0.0  ;;  %v1075_v27 = vpack.c.b16 %v1045_v21, %v1044_v20  ;;  %v888_v44 = vsel %vm2562_vm3, %v2607_v31, 0 }
  0xae   : > { %v2601_v28 = vmax.f32 %v513_v22, 0.0  ;;  %1351 = vrot.lane.b32.xlu1 %v1335_v23, %s2381_s29  ;;  %v1156_v54 = vunpack.c.l.b16 %v888_v44 }
  0xaf   : > { %v594_v29 = vpack.c.bf16 %v2599_v26, %v2599_v26  ;;  %1092 = vrot.lane.b32.xlu0 %v1075_v27, %s2382_s8  ;;  %v802_v61 = vrot.slane %v2599_v26, 1 }
  0xb0   : > { %v616_v32 = vrot.slane %v2601_v28, 7  ;;  %v785_v33 = vrot.slane %v2601_v28, 1  ;;  %v443_v34 = vpop.f32.mrf.mxu3  ;;  %v577_v46 = vpack.c.bf16 %v2601_v28, %v2601_v28 }
  0xb1   : > { %v496_v35 = vmul.f32 %v2540_v49, %v443_v34  ;;  %v400_v36 = vpop.f32.mrf.mxu0  ;;  %v1322_v37 = vunpack.c.l.b16 %v594_v29  ;;  %v772_v52 = vsel %vm2562_vm3, %v594_v29, 0  ;;  %v828_v18 = vsel %vm815_vm5, %v4387_v57, %v802_v61 }
  0xb2   : > { %v479_v38 = vmul.f32 %v2540_v49, %v400_v36  ;;  %v845_v39 = vsel %vm815_vm5, %v784_v6, %v785_v33  ;;  %v676_v47 = vsel %vm646_vm4, %v615_v5, %v616_v32  ;;  %v1063_v6 = vunpack.c.l.b16 %v772_v52 }
  0xb3   : > { %v531_v41 = vadd.f32 %v2545_v50, %v496_v35  ;;  %v1344_v42 = vpack.c.b16 %v1322_v37, %v1321_v30  ;;  %v2622_v43 = vpack.c.bf16 %v845_v39, %v845_v39  ;;  %v683_v60 = vpack.c.bf16 %v676_v47, %v676_v47 }
  0xb4   : > { %v514_v45 = vadd.f32 %v2545_v50, %v479_v38  ;;  %v1084_v17 = vpack.c.b16 %v1063_v6, %v1062_v59  ;;  %v868_v27 = vpack.c.bf16 %v828_v18, %v828_v18  ;;  %v633_v36 = vrot.slane %v2599_v26, 7 }
  0xb5   : > { %v2632_v48 = vmax.f32 %v531_v41, 0.0  ;;  %v889_v51 = vsel %vm2617_vm7, %v2622_v43, 0  ;;  %v722_v16 = vsel %vm2647_vm9, %v683_v60, 0  ;;  %v1305_v6 = vunpack.c.l.b16 %v577_v46 }
  0xb6   : > { %v2640_v53 = vmax.f32 %v514_v45, 0.0  ;;  %1369 = vrot.lane.b32.xlu1 %v1344_v42, %s2381_s29  ;;  %v1157_v55 = vunpack.c.l.b16 %v889_v51  ;;  %v966_v22 = vunpack.c.l.b16 %v722_v16  ;;  %v906_v39 = vsel %vm2562_vm3, %v868_v27, 0 }
  0xb7   : > { %v803_v58 = vrot.slane %v2632_v48, 1  ;;  %v634_v29 = vrot.slane %v2632_v48, 7  ;;  %v1174_v51 = vunpack.c.l.b16 %v906_v39 }
  0xb8   : > { %v617_v0 = vrot.slane %v2640_v53, 7  ;;  %v445_v2 = vpop.f32.mrf.mxu3  ;;  %v1187_v5 = vpack.c.b16 %v1157_v55, %v1156_v54  ;;  %v578_v41 = vpack.c.bf16 %v2640_v53, %v2640_v53  ;;  %v786_v18 = vrot.slane %v2640_v53, 1 }
  0xb9   : > { %v497_v8 = vmul.f32 %v2540_v49, %v445_v2  ;;  %v403_v11 = vpop.f32.mrf.mxu0  ;;  %v827_v13 = vsel %vm815_vm5, %v802_v61, %v803_v58  ;;  %v658_v44 = vsel %vm646_vm4, %v633_v36, %v634_v29  ;;  %v929_v53 = vsel %vm2805_vm11, %v2622_v43, 0 }
  0xba   : > { %1204 = vrot.lane.b32.xlu2 %v1187_v5, %s2383_s9  ;;  %v675_v12 = vsel %vm646_vm4, %v616_v32, %v617_v0  ;;  %v869_v21 = vpack.c.bf16 %v827_v13, %v827_v13  ;;  %v480_v37 = vmul.f32 %v2540_v49, %v403_v11  ;;  %v701_v52 = vpack.c.bf16 %v658_v44, %v658_v44 }
  0xbb   : > { %v532_v14 = vadd.f32 %v2545_v50, %v497_v8  ;;  %v684_v15 = vpack.c.bf16 %v675_v12, %v675_v12  ;;  %v1306_v59 = vunpack.c.l.b16 %v578_v41  ;;  %v756_v13 = vsel %vm2562_vm3, %v578_v41, 0 }
  0xbc   : > { %v907_v35 = vsel %vm2617_vm7, %v869_v21, 0  ;;  %v515_v47 = vadd.f32 %v2545_v50, %v480_v37  ;;  %v740_v8 = vsel %vm2647_vm9, %v701_v52, 0 }
  0xbd   : > { %v2668_v19 = vmax.f32 %v532_v14, 0.0  ;;  %v723_v20 = vsel %vm2562_vm3, %v684_v15, 0  ;;  %v1175_v42 = vunpack.c.l.b16 %v907_v35  ;;  %v1336_v11 = vpack.c.b16 %v1306_v59, %v1305_v6 }
  0xbe   : > { %1110 = vrot.lane.b32.xlu1 %v1084_v17, %s2382_s8  ;;  %v967_v23 = vunpack.c.l.b16 %v723_v20  ;;  %v2706_v2 = vmax.f32 %v515_v47, 0.0  ;;  %v984_v16 = vunpack.c.l.b16 %v740_v8 }
  0xbf   : > { %v635_v24 = vrot.slane %v2668_v19, 7  ;;  %v1196_v55 = vpack.c.b16 %v1175_v42, %v1174_v51  ;;  %v596_v39 = vpack.c.bf16 %v2668_v19, %v2668_v19 }
  0xc0   : > { %v448_v30 = vpop.f32.mrf.mxu3  ;;  %v2675_v32 = vpack.c.b16 %v967_v23, %v966_v22  ;;  %v787_v14 = vrot.slane %v2706_v2, 1  ;;  %v1047_v22 = vunpack.c.l.b16 %v756_v13 }
  0xc1   : > { %v405_v34 = vpop.f32.mrf.mxu0  ;;  %v657_v38 = vsel %vm646_vm4, %v634_v29, %v635_v24  ;;  %v774_v51 = vsel %vm2562_vm3, %v596_v39, 0 }
  0xc2   : > { %1388 = vrot.lane.b32.xlu2 %v1187_v5, %s2384_s13  ;;  %1425 = vrot.lane.b32.xlu0 %v2675_v32, %s2385_s14  ;;  %v702_v45 = vpack.c.bf16 %v657_v38, %v657_v38  ;;  %v498_v5 = vmul.f32 %v2540_v49, %v448_v30  ;;  %v481_v29 = vmul.f32 %v2540_v49, %v405_v34  ;;  %v1065_v8 = vunpack.c.l.b16 %v774_v51 }
  0xc3   : > { %v843_v35 = vsel %vm815_vm5, %v786_v18, %v787_v14  ;;  %v844_v38 = vsel %vm815_vm5, %v785_v33, %v786_v18  ;;  %v595_v34 = vpack.c.bf16 %v2632_v48, %v2632_v48  ;;  %v1324_v48 = vunpack.c.l.b16 %v596_v39 }
  0xc4   : > { %v741_v61 = vsel %vm2562_vm3, %v702_v45, 0  ;;  %v533_v15 = vadd.f32 %v2545_v50, %v498_v5  ;;  %v853_v41 = vpack.c.bf16 %v843_v35, %v843_v35  ;;  %v516_v44 = vadd.f32 %v2545_v50, %v481_v29 }
  0xc5   : > { %v985_v12 = vunpack.c.l.b16 %v741_v61  ;;  %v852_v45 = vpack.c.bf16 %v844_v38, %v844_v38  ;;  %v773_v33 = vsel %vm2562_vm3, %v595_v34, 0  ;;  %v1323_v35 = vunpack.c.l.b16 %v595_v34 }
  0xc6   : > { %1483 = vrot.lane.b32.xlu1 %v1084_v17, %s2386_s15  ;;  %v755_v17 = vsel %vm2562_vm3, %v577_v46, 0  ;;  %v2728_v27 = vmax.f32 %v533_v15, 0.0  ;;  %v804_v46 = vrot.slane %v2668_v19, 1  ;;  %v891_v52 = vsel %vm2617_vm7, %v853_v41, 0 }
  0xc7   : > { %v2724_v21 = vpack.c.b16 %v985_v12, %v984_v16  ;;  %v1046_v30 = vunpack.c.l.b16 %v755_v17  ;;  %v2760_v59 = vmax.f32 %v516_v44, 0.0  ;;  %v890_v5 = vsel %vm2562_vm3, %v852_v45, 0 }
  0xc8   : > { %v2700_v54 = vpop.f32.mrf.mxu3  ;;  %v805_v42 = vrot.slane %v2728_v27, 1  ;;  %v1064_v6 = vunpack.c.l.b16 %v773_v33  ;;  %v826_v12 = vsel %vm815_vm5, %v803_v58, %v804_v46  ;;  %v1158_v15 = vunpack.c.l.b16 %v890_v5 }
  0xc9   : > { %v2702_v60 = vpop.f32.mrf.mxu0  ;;  %v1076_v37 = vpack.c.b16 %v1047_v22, %v1046_v30  ;;  %v619_v13 = vrot.slane %v2760_v59, 7  ;;  %v4390_v16 = vrot.slane %v2566_v3, 7  ;;  %v618_v17 = vrot.slane %v2706_v2, 7 }
  0xca   : > { %1222 = vrot.lane.b32.xlu2 %v1196_v55, %s2383_s9  ;;  %1241 = vrot.lane.b32.xlu0 %v2675_v32, %s2387_s16  ;;  %v825_v61 = vsel %vm815_vm5, %v804_v46, %v805_v42  ;;  %v870_v18 = vpack.c.bf16 %v826_v12, %v826_v12  ;;  %v1085_v29 = vpack.c.b16 %v1065_v8, %v1064_v6  ;;  %v2826_v8 = vunpack.c.l.b16 %v929_v53 }
  0xcb   : > { %v2799_v34 = vsel %vm646_vm4, %v4390_v16, %v633_v36  ;;  %v1345_v39 = vpack.c.b16 %v1324_v48, %v1323_v35  ;;  %v674_v45 = vsel %vm646_vm4, %v617_v0, %v618_v17  ;;  %v928_v36 = vsel %vm2805_vm11, %v2607_v31, 0 }
  0xcc   : > { %v908_v41 = vsel %vm2562_vm3, %v870_v18, 0  ;;  %v685_v51 = vpack.c.bf16 %v674_v45, %v674_v45  ;;  %v2824_v6 = vunpack.c.l.b16 %v928_v36  ;;  %4430 = vst [vmem:[#allocation8_spill] sm:$0xff] %v2826_v8  ;;  %v499_v31 = vmul.f32 %v2540_v49, %v2700_v54 }
  0xcd   : > { %v1176_v26 = vunpack.c.l.b16 %v908_v41  ;;  %v579_v12 = vpack.c.bf16 %v2706_v2, %v2706_v2  ;;  %v597_v45 = vpack.c.bf16 %v2728_v27, %v2728_v27  ;;  %v636_v53 = vrot.slane %v2728_v27, 7 }
  0xce   : > { %1353 = vrot.lane.b32.xlu1 %v1336_v11, %s2381_s29  ;;  %v1159_v11 = vunpack.c.l.b16 %v891_v52  ;;  %4429 = vst [vmem:[#allocation7_spill] sm:$0xff] %v2824_v6  ;;  %v724_v43 = vsel %vm2647_vm9, %v685_v51, 0  ;;  %v534_v54 = vadd.f32 %v2545_v50, %v499_v31 }
  0xcf   : > { %v1307_v48 = vunpack.c.l.b16 %v579_v12 }
  0xd0   : > { %v2722_v20 = vpop.f32.mrf.mxu3  ;;  %v1188_v30 = vpack.c.b16 %v1159_v11, %v1158_v15  ;;  %v2849_v41 = vmax.f32 %v534_v54, 0.0 }
  0xd1   : > { %v2726_v23 = vpop.f32.mrf.mxu0 }
  0xd2   : > { %1520 = vrot.lane.b32.xlu2 %v1196_v55, %s2388_s17  ;;  %1443 = vrot.lane.b32.xlu0 %v2724_v21, %s2385_s14 }
  0xd6   : > { %1094 = vrot.lane.b32.xlu1 %v1076_v37, %s2382_s8 }
  0xd8   : > { %v2750_v28 = vpop.f32.mrf.mxu3 }
  0xd9   : > { %v2752_v47 = vpop.f32.mrf.mxu0 }
  0xda   : > { %1406 = vrot.lane.b32.xlu2 %v1196_v55, %s2384_s13  ;;  %1259 = vrot.lane.b32.xlu0 %v2724_v21, %s2387_s16  ;;  %v871_v55 = vpack.c.bf16 %v825_v61, %v825_v61 }
  0xdc   : > { %v909_v58 = vsel %vm2617_vm7, %v871_v55, 0  ;;  %v580_v55 = vpack.c.bf16 %v2760_v59, %v2760_v59 }
  0xdd   : > { %v1177_v44 = vunpack.c.l.b16 %v909_v58 }
  0xde   : > { %1467 = vrot.lane.b32.xlu1 %v1076_v37, %s2386_s15  ;;  %v673_v37 = vsel %vm646_vm4, %v618_v17, %v619_v13  ;;  %v968_v17 = vunpack.c.l.b16 %v724_v43  ;;  %v1308_v58 = vunpack.c.l.b16 %v580_v55 }
  0xdf   : > { %v686_v46 = vpack.c.bf16 %v673_v37, %v673_v37  ;;  %v2818_v0 = vpack.c.b16 %v1177_v44, %v1176_v26  ;;  %v500_v44 = vmul.f32 %v2540_v49, %v2722_v20  ;;  %v757_v26 = vsel %vm2562_vm3, %v579_v12, 0 }
  0xe0   : > { %v2779_v22 = vpop.f32.mrf.mxu3  ;;  %v4389_v20 = vrot.slane %v2849_v41, 7  ;;  %v775_v12 = vsel %vm2562_vm3, %v597_v45, 0 }
  0xe1   : > { %v2781_v38 = vpop.f32.mrf.mxu0  ;;  %v725_v5 = vsel %vm2562_vm3, %v686_v46, 0  ;;  %v598_v46 = vpack.c.bf16 %v2849_v41, %v2849_v41  ;;  %v535_v36 = vadd.f32 %v2545_v50, %v500_v44 }
  0xe2   : > { %1112 = vrot.lane.b32.xlu2 %v1085_v29, %s2382_s8  ;;  %1206 = vrot.lane.b32.xlu0 %v1188_v30, %s2383_s9  ;;  %v969_v15 = vunpack.c.l.b16 %v725_v5  ;;  %v1048_v5 = vunpack.c.l.b16 %v757_v26 }
  0xe3   : > { %v2881_v54 = vmax.f32 %v535_v36, 0.0 }
  0xe4   : > { %v2845_v35 = vpack.c.b16 %v969_v15, %v968_v17  ;;  %v483_v17 = vmul.f32 %v2540_v49, %v2726_v23  ;;  %v806_v23 = vrot.slane %v2849_v41, 1 }
  0xe5   : > { %v4394_v36 = vrot.slane %v2881_v54, 1 }
  0xe6   : > { %1371 = vrot.lane.b32.xlu1 %v1345_v39, %s2381_s29  ;;  %4431 = vst [vmem:[#allocation9_spill] sm:$0xff] %v2845_v35  ;;  %v482_v39 = vmul.f32 %v2540_v49, %v2702_v60  ;;  %v758_v60 = vsel %vm2562_vm3, %v580_v55, 0  ;;  %v776_v55 = vsel %vm2562_vm3, %v598_v46, 0  ;;  %v518_v11 = vadd.f32 %v2545_v50, %v483_v17 }
  0xe7   : > { %v1049_v31 = vunpack.c.l.b16 %v758_v60  ;;  %v1067_v44 = vunpack.c.l.b16 %v776_v55  ;;  %v788_v60 = vrot.slane %v2760_v59, 1  ;;  %v823_v17 = vsel %vm815_vm5, %v806_v23, %v4394_v36 }
  0xe8   : > { %v2816_v52 = vpop.f32.mrf.mxu3  ;;  %v2913_v55 = vmax.f32 %v518_v11, 0.0  ;;  %v1325_v11 = vunpack.c.l.b16 %v597_v45 }
  0xe9   : > { %v2820_v61 = vpop.f32.mrf.mxu0 }
  0xea   : > { %1504 = vrot.lane.b32.xlu2 %v1188_v30, %s2388_s17  ;;  %1224 = vrot.lane.b32.xlu0 %v2818_v0, %s2383_s9  ;;  %v4392_v10 = vrot.slane %v2913_v55, 7  ;;  %v486_v6 = vmul.f32 %v2540_v49, %v2820_v61  ;;  %v4437_v61 = vrot.slane %v2881_v54, 1 }
  0xee   : > { %1485 = vrot.lane.b32.xlu1 %v1085_v29, %s2386_s15  ;;  %v1337_v29 = vpack.c.b16 %v1308_v58, %v1307_v48  ;;  %v655_v48 = vsel %vm646_vm4, %v636_v53, %v4389_v20  ;;  %v1077_v58 = vpack.c.b16 %v1049_v31, %v1048_v5 }
  0xef   : > { %v704_v26 = vpack.c.bf16 %v655_v48, %v655_v48  ;;  %v1326_v48 = vunpack.c.l.b16 %v598_v46 }
  0xf0   : > { %v2843_v18 = vpop.f32.mrf.mxu3 }
  0xf1   : > { %v2847_v37 = vpop.f32.mrf.mxu0  ;;  %v1346_v16 = vpack.c.b16 %v1326_v48, %v1325_v11 }
  0xf2   : > { %1390 = vrot.lane.b32.xlu2 %v1188_v30, %s2384_s13  ;;  %1427 = vrot.lane.b32.xlu0 %v2845_v35, %s2385_s14  ;;  %v517_v30 = vadd.f32 %v2545_v50, %v482_v39  ;;  %v1066_v39 = vunpack.c.l.b16 %v775_v12 }
  0xf4   : > { %v2879_v15 = vmax.f32 %v517_v30, 0.0  ;;  %v1086_v19 = vpack.c.b16 %v1067_v44, %v1066_v39 }
  0xf6   : > { %1355 = vrot.lane.b32.xlu1 %v1337_v29, %s2381_s29  ;;  %v656_v29 = vsel %vm646_vm4, %v635_v24, %v636_v53  ;;  %v789_v30 = vrot.slane %v2879_v15, 1  ;;  %v743_v24 = vsel %vm2562_vm3, %v704_v26, 0  ;;  %v824_v53 = vsel %vm815_vm5, %v805_v42, %v806_v23 }
  0xf7   : > { %v703_v5 = vpack.c.bf16 %v656_v29, %v656_v29  ;;  %v842_v42 = vsel %vm815_vm5, %v787_v14, %v788_v60  ;;  %v987_v39 = vunpack.c.l.b16 %v743_v24  ;;  %v872_v44 = vpack.c.bf16 %v824_v53, %v824_v53 }
  0xf8   : > { %v2871_v51 = vpop.f32.mrf.mxu3  ;;  %v841_v27 = vsel %vm815_vm5, %v788_v60, %v789_v30  ;;  %v873_v29 = vpack.c.bf16 %v823_v17, %v823_v17  ;;  %v854_v26 = vpack.c.bf16 %v842_v42, %v842_v42  ;;  %v620_v57 = vrot.slane %v2879_v15, 7 }
  0xf9   : > { %v2873_v43 = vpop.f32.mrf.mxu0  ;;  %v855_v23 = vpack.c.bf16 %v841_v27, %v841_v27  ;;  %v910_v45 = vsel %vm2562_vm3, %v872_v44, 0  ;;  %v484_v53 = vmul.f32 %v2540_v49, %v2752_v47 }
  0xfa   : > { %1522 = vrot.lane.b32.xlu2 %v2818_v0, %s2388_s17  ;;  %1243 = vrot.lane.b32.xlu0 %v2845_v35, %s2387_s16  ;;  %v892_v24 = vsel %vm2562_vm3, %v854_v26, 0  ;;  %v672_v17 = vsel %vm646_vm4, %v619_v13, %v620_v57  ;;  %v1178_v42 = vunpack.c.l.b16 %v910_v45  ;;  %v502_v13 = vmul.f32 %v2540_v49, %v2779_v22 }
  0xfb   : > { %v1160_v47 = vunpack.c.l.b16 %v892_v24 }
  0xfc   : > { %v537_v24 = vadd.f32 %v2545_v50, %v502_v13 }
  0xfe   : > { %1096 = vrot.lane.b32.xlu1 %v1077_v58, %s2382_s8  ;;  %v3024_v13 = vmax.f32 %v537_v24, 0.0 }
 0x100   : > { %v2903_v31 = vpop.f32.mrf.mxu3 }
 0x101   : > { %v2905_v12 = vpop.f32.mrf.mxu0 }
 0x102   : > { %1408 = vrot.lane.b32.xlu2 %v2818_v0, %s2384_s13  ;;  %1114 = vrot.lane.b32.xlu0 %v1086_v19, %s2382_s8  ;;  %v742_v0 = vsel %vm2647_vm9, %v703_v5, 0  ;;  %v911_v5 = vsel %vm2617_vm7, %v873_v29, 0  ;;  %v519_v29 = vadd.f32 %v2545_v50, %v484_v53 }
 0x103   : > { %v986_v2 = vunpack.c.l.b16 %v742_v0  ;;  %v1179_v0 = vunpack.c.l.b16 %v911_v5 }
 0x104   : > { %v2990_v22 = vmax.f32 %v519_v29, 0.0  ;;  %v582_v29 = vpack.c.bf16 %v2913_v55, %v2913_v55 }
 0x105   : > { %v2935_v14 = vpack.c.b16 %v987_v39, %v986_v2  ;;  %v687_v39 = vpack.c.bf16 %v672_v17, %v672_v17  ;;  %v2975_v26 = vpack.c.b16 %v1179_v0, %v1178_v42  ;;  %v790_v0 = vrot.slane %v2913_v55, 1 }
 0x106   : > { %1469 = vrot.lane.b32.xlu1 %v1077_v58, %s2386_s15  ;;  %v893_v58 = vsel %vm2617_vm7, %v855_v23, 0 }
 0x107   : > { %4432 = vst [vmem:[#allocation10_spill] sm:$0xff] %v2935_v14  ;;  %v1161_v11 = vunpack.c.l.b16 %v893_v58  ;;  %v726_v45 = vsel %vm2647_vm9, %v687_v39, 0 }
 0x108   : > { %v470_v20 = vpop.f32.mrf.mxu3  ;;  %v970_v53 = vunpack.c.l.b16 %v726_v45 }
 0x109   : > { %v507_v46 = vmul.f32 %v2540_v49, %v470_v20  ;;  %v2940_v60 = vpop.f32.mrf.mxu0  ;;  %v671_v20 = vsel %vm646_vm4, %v620_v57, %v4392_v10  ;;  %v2970_v57 = vpack.c.bf16 %v2597_v25, %v2597_v25 }
 0x10a   : > { %1373 = vrot.lane.b32.xlu2 %v1346_v16, %s2381_s29  ;;  %1445 = vrot.lane.b32.xlu0 %v2935_v14, %s2385_s14  ;;  %v501_v16 = vmul.f32 %v2540_v49, %v2750_v28  ;;  %v688_v44 = vpack.c.bf16 %v671_v20, %v671_v20  ;;  %v1189_v28 = vpack.c.b16 %v1161_v11, %v1160_v47  ;;  %v4393_v47 = vrot.slane %v2990_v22, 1 }
 0x10b   : > { %v542_v27 = vadd.f32 %v2545_v50, %v507_v46  ;;  %v721_v5 = vsel %vm2562_vm3, %v2970_v57, 0  ;;  %v3012_v11 = vpack.c.bf16 %v2881_v54, %v2881_v54 }
 0x10c   : > { %v536_v23 = vadd.f32 %v2545_v50, %v501_v16  ;;  %v965_v42 = vunpack.c.l.b16 %v721_v5  ;;  %v485_v5 = vmul.f32 %v2540_v49, %v2781_v38 }
 0x10d   : > { %v2964_v48 = vmax.f32 %v542_v27, 0.0  ;;  %v1327_v24 = vunpack.c.l.b16 %v3012_v11 }
 0x10e   : > { %1487 = vrot.lane.b32.xlu1 %v1086_v19, %s2386_s15  ;;  %v727_v19 = vsel %vm2562_vm3, %v688_v44, 0  ;;  %v3004_v17 = vmax.f32 %v536_v23, 0.0  ;;  %v581_v44 = vpack.c.bf16 %v2879_v15, %v2879_v15  ;;  %v520_v10 = vadd.f32 %v2545_v50, %v485_v5 }
 0x10f   : > { %v4391_v59 = vrot.slane %v2964_v48, 7  ;;  %v971_v20 = vunpack.c.l.b16 %v727_v19  ;;  %v839_v19 = vsel %vm815_vm5, %v790_v0, %v4393_v47 }
 0x110   : > { %v3016_v16 = vpack.c.bf16 %v3004_v17, %v3004_v17  ;;  %v759_v15 = vsel %vm2562_vm3, %v581_v44, 0  ;;  %v857_v38 = vpack.c.bf16 %v839_v19, %v839_v19  ;;  %v4436_v19 = vrot.slane %v3024_v13, 1 }
 0x111   : > { %v2978_v2 = vpop.f32.mrf.mxu0  ;;  %v678_v25 = vsel %vm646_vm4, %v4391_v59, %v614_v9  ;;  %v3026_v23 = vpack.c.b16 %v971_v20, %v970_v53  ;;  %v808_v20 = vrot.slane %v3004_v17, 1  ;;  %v1310_v59 = vunpack.c.l.b16 %v582_v29 }
 0x112   : > { %1410 = vrot.lane.b32.xlu0 %v2975_v26, %s2384_s13  ;;  %1506 = vrot.lane.b32.xlu2 %v1189_v28, %s2388_s17  ;;  %v2995_v46 = vpack.c.bf16 %v678_v25, %v678_v25  ;;  %v840_v25 = vsel %vm815_vm5, %v789_v30, %v790_v0  ;;  %v1328_v53 = vunpack.c.l.b16 %v3016_v16  ;;  %v760_v30 = vsel %vm2562_vm3, %v582_v29, 0 }
 0x113   : > { %4433 = vst [vmem:[#allocation11_spill] sm:$0xff] %v3026_v23  ;;  %v856_v0 = vpack.c.bf16 %v840_v25, %v840_v25  ;;  %v1050_v63 = vunpack.c.l.b16 %v759_v15  ;;  %v1051_v4 = vunpack.c.l.b16 %v760_v30  ;;  %v821_v25 = vsel %vm815_vm5, %v808_v20, %v4436_v19 }
 0x114   : > { %v1205_v58 = vpop.permute.xlu2 %1204  ;;  %v720_v9 = vsel %vm2647_vm9, %v2995_v46, 0  ;;  %v1347_v47 = vpack.c.b16 %v1328_v53, %v1327_v24  ;;  %v822_v24 = vsel %vm815_vm5, %v4437_v61, %v808_v20  ;;  %v638_v53 = vrot.slane %v2881_v54, 7 }
 0x115   : > { %v964_v27 = vunpack.c.l.b16 %v720_v9  ;;  %v894_v29 = vsel %vm2562_vm3, %v856_v0, 0  ;;  %v506_v15 = vmul.f32 %v2540_v49, %v2903_v31  ;;  %v521_v20 = vadd.f32 %v2545_v50, %v486_v6 }
 0x116   : > { %1261 = vrot.lane.b32.xlu1 %v2935_v14, %s2387_s16  ;;  %v1162_v0 = vunpack.c.l.b16 %v894_v29  ;;  %v700_v54 = vpack.c.bf16 %v2799_v34, %v2799_v34  ;;  %v3093_v31 = vpack.c.bf16 %v2990_v22, %v2990_v22  ;;  %v923_v6 = vsel %vm2805_vm11, %v2970_v57, 0 }
 0x117   : > { %v3018_v39 = vpack.c.b16 %v965_v42, %v964_v27  ;;  %v1309_v42 = vunpack.c.l.b16 %v581_v44  ;;  %v541_v34 = vadd.f32 %v2545_v50, %v506_v15  ;;  %v3108_v29 = vpack.c.bf16 %v3024_v13, %v3024_v13 }
 0x118   : > { %4438 = vst [vmem:[#allocation14_spill] sm:$0xff] %v3093_v31  ;;  %v3116_v61 = vmax.f32 %v521_v20, 0.0 }
 0x119   : > { %v3028_v45 = vpop.f32.mrf.mxu0  ;;  %v1338_v9 = vpack.c.b16 %v1310_v59, %v1309_v42  ;;  %v503_v42 = vmul.f32 %v2540_v49, %v2816_v52  ;;  %v875_v52 = vpack.c.bf16 %v821_v25, %v821_v25 }
 0x11a   : > { %1392 = vrot.lane.b32.xlu2 %v1189_v28, %s2384_s13  ;;  %1429 = vrot.lane.b32.xlu0 %v3026_v23, %s2385_s14 }
 0x11c   : > { %v3047_v27 = vpop.permute.xlu2 %1388 }
 0x11d   : > { %4434 = vst [vmem:[#allocation12_spill] sm:$0xff] %v3047_v27 }
 0x11e   : > { %1208 = vrot.lane.b32.xlu1 %v1189_v28, %s2383_s9  ;;  %v895_v28 = vsel %vm2617_vm7, %v857_v38, 0 }
 0x11f   : > { %v1163_v38 = vunpack.c.l.b16 %v895_v28 }
 0x120   : > { %v3055_v36 = vpop.permute.xlu1 %1351 }
 0x121   : > { %4435 = vst [vmem:[#allocation13_spill] sm:$0xff] %v3055_v36  ;;  %v1093_v44 = vpop.permute.xlu0 %1092  ;;  %v435_v8 = vpop.f32.mrf.mxu0 }
 0x122   : > { %v1541_v59 = vsel %vm331_vm1, %v3018_v39, %v1093_v44  ;;  %v493_v5 = vmul.f32 %v2540_v49, %v435_v8  ;;  %1375 = vrot.lane.b32.xlu0 %v1347_v47, %s2381_s29  ;;  %1357 = vrot.lane.b32.xlu2 %v1338_v9, %s2381_s29  ;;  %v1078_v9 = vpack.c.b16 %v1051_v4, %v1050_v63 }
 0x123   : > { %v3082_v30 = vsel %vm1584_vm12, %v1541_v59, %v1205_v58  ;;  %v874_v44 = vpack.c.bf16 %v822_v24, %v822_v24  ;;  %v3095_v58 = vmax.f32 %v520_v10, 0.0  ;;  %v538_v4 = vadd.f32 %v2545_v50, %v503_v42 }
 0x124   : > { %v528_v8 = vadd.f32 %v2545_v50, %v493_v5  ;;  %v3085_v47 = vpop.permute.xlu2 %1222  ;;  %v3114_v5 = vpack.c.b16 %v1163_v38, %v1162_v0  ;;  %v739_v24 = vsel %vm2562_vm3, %v700_v54, 0  ;;  %v913_v42 = vsel %vm2617_vm7, %v875_v52, 0 }
 0x125   : > { %v912_v57 = vsel %vm2562_vm3, %v874_v44, 0  ;;  %v3126_v15 = vpack.c.bf16 %v3095_v58, %v3095_v58  ;;  %v504_v0 = vmul.f32 %v2540_v49, %v2843_v18  ;;  %v4441_v38 = vrot.slane %v2566_v3, 7 }
 0x126   : > { %v3097_v59 = vmax.f32 %v528_v8, 0.0  ;;  %1471 = vrot.lane.b32.xlu1 %v1078_v9, %s2386_s15  ;;  %v3140_v54 = vmax.f32 %v538_v4, 0.0  ;;  %v487_v44 = vmul.f32 %v2540_v49, %v2847_v37  ;;  %v3144_v52 = vmax.f32 %v541_v34, 0.0 }
 0x127   : > { %4440 = vst [vmem:[#allocation16_spill] sm:$0xff] %v3126_v15  ;;  %v983_v63 = vunpack.c.l.b16 %v739_v24  ;;  %v1180_v8 = vunpack.c.l.b16 %v912_v57  ;;  %v1181_v19 = vunpack.c.l.b16 %v913_v42  ;;  %v3156_v37 = vunpack.c.l.b16 %v923_v6 }
 0x128   : > { %v4399_v28 = vrot.slane %v3097_v59, 7  ;;  %v3112_v25 = vpop.permute.xlu1 %1369  ;;  %v539_v34 = vadd.f32 %v2545_v50, %v504_v0  ;;  %v4444_v24 = vrot.slane %v3004_v17, 7  ;;  %v4445_v42 = vrot.slane %v2849_v41, 7 }
 0x129   : > { %4439 = vst [vmem:[#allocation15_spill] sm:$0xff] %v3112_v25  ;;  %v3151_v25 = vpack.c.bf16 %v3140_v54, %v3140_v54  ;;  %v814_v0 = vrot.slane %v2964_v48, 1  ;;  %v3177_v27 = vpack.c.b16 %v1181_v19, %v1180_v8  ;;  %v778_v41 = vsel %vm2562_vm3, %v3016_v16, 0 }
 0x12a   : > { %1098 = vrot.lane.b32.xlu2 %v1078_v9, %s2382_s8  ;;  %1394 = vrot.lane.b32.xlu0 %v3114_v5, %s2384_s13  ;;  %v660_v20 = vsel %vm646_vm4, %v4399_v28, %v4441_v38  ;;  %v792_v9 = vrot.slane %v3095_v58, 1  ;;  %4443 = vst [vmem:[#allocation18_spill] sm:$0xff] %v3156_v37  ;;  %v653_v57 = vsel %vm646_vm4, %v638_v53, %v4444_v24  ;;  %v4452_v14 = vrot.slane %v3144_v52, 1 }
 0x12b   : > { %v699_v18 = vpack.c.bf16 %v660_v20, %v660_v20  ;;  %v654_v28 = vsel %vm646_vm4, %v4445_v42, %v638_v53  ;;  %4447 = vst [vmem:[#allocation20_spill] sm:$0xff] %v3177_v27  ;;  %v779_v53 = vsel %vm2562_vm3, %v3108_v29, 0  ;;  %v706_v42 = vpack.c.bf16 %v653_v57, %v653_v57 }
 0x12c   : > { %v3147_v10 = vpop.permute.xlu2 %1520  ;;  %v705_v24 = vpack.c.bf16 %v654_v28, %v654_v28  ;;  %v505_v16 = vmul.f32 %v2540_v49, %v2871_v51  ;;  %v4449_v28 = vrot.slane %v2990_v22, 1 }
 0x12d   : > { %4442 = vst [vmem:[#allocation17_spill] sm:$0xff] %v3147_v10  ;;  %v738_v38 = vsel %vm2647_vm9, %v699_v18, 0  ;;  %v522_v18 = vadd.f32 %v2545_v50, %v487_v44  ;;  %v780_v44 = vsel %vm2562_vm3, %v3151_v25, 0 }
 0x12e   : > { %1226 = vrot.lane.b32.xlu1 %v2975_v26, %s2383_s9  ;;  %v982_v20 = vunpack.c.l.b16 %v738_v38  ;;  %v777_v38 = vsel %vm2562_vm3, %v3012_v11, 0  ;;  %v4448_v11 = vrot.slane %v3116_v61, 1 }
 0x12f   : > { %v1068_v57 = vunpack.c.l.b16 %v777_v38 }
 0x130   : > { %v1111_v4 = vpop.permute.xlu1 %1110  ;;  %v3175_v10 = vpack.c.b16 %v983_v63, %v982_v20  ;;  %v837_v19 = vsel %vm815_vm5, %v792_v9, %v4448_v11  ;;  %v838_v20 = vsel %vm815_vm5, %v4449_v28, %v792_v9  ;;  %v1069_v11 = vunpack.c.l.b16 %v778_v41 }
 0x131   : > { %v1070_v63 = vunpack.c.l.b16 %v779_v53  ;;  %v859_v36 = vpack.c.bf16 %v837_v19, %v837_v19  ;;  %v4453_v9 = vrot.slane %v2550_v56, 1  ;;  %v3221_v41 = vmax.f32 %v539_v34, 0.0 }
 0x132   : > { %4446 = vst [vmem:[#allocation19_spill] sm:$0xff] %v3175_v10  ;;  %v1568_v8 = vsel %vm331_vm1, %v3175_v10, %v1111_v4  ;;  %1524 = vrot.lane.b32.xlu2 %v2975_v26, %s2388_s17  ;;  %1526 = vrot.lane.b32.xlu0 %v3177_v27, %s2388_s17  ;;  %v1071_v26 = vunpack.c.l.b16 %v780_v44  ;;  %v816_v10 = vsel %vm815_vm5, %v4452_v14, %v814_v0  ;;  %v922_v14 = vsel %vm2805_vm11, %v2995_v46, 0 }
 0x133   : > { %v3207_v51 = vsel %vm1584_vm12, %v1568_v8, %v3085_v47  ;;  %v847_v38 = vsel %vm815_vm5, %v814_v0, %v4453_v9  ;;  %v744_v47 = vsel %vm2647_vm9, %v705_v24, 0  ;;  %v858_v53 = vpack.c.bf16 %v838_v20, %v838_v20 }
 0x134   : > { %v3209_v6 = vpop.permute.xlu2 %1406  ;;  %v3211_v4 = vpop.permute.xlu0 %1425  ;;  %v3225_v8 = vpack.c.bf16 %v816_v10, %v816_v10  ;;  %v540_v44 = vadd.f32 %v2545_v50, %v505_v16  ;;  %v488_v19 = vmul.f32 %v2540_v49, %v2873_v43  ;;  %v3232_v56 = vpack.c.bf16 %v847_v38, %v847_v38 }
 0x135   : > { %4450 = vst [vmem:[#allocation21_spill] sm:$0xff] %v3209_v6  ;;  %v489_v34 = vmul.f32 %v2540_v49, %v2905_v12  ;;  %v745_v10 = vsel %vm2562_vm3, %v706_v42, 0  ;;  %v3244_v43 = vunpack.c.l.b16 %v922_v14  ;;  %v1087_v16 = vpack.c.b16 %v1069_v11, %v1068_v57 }
 0x136   : > { %4451 = vst [vmem:[#allocation22_spill] sm:$0xff] %v3211_v4  ;;  %1245 = vrot.lane.b32.xlu1 %v3026_v23, %s2387_s16  ;;  %v920_v0 = vsel %vm2562_vm3, %v3225_v8, 0  ;;  %v3248_v28 = vpack.c.b16 %v1071_v26, %v1070_v63  ;;  %v897_v46 = vsel %vm2617_vm7, %v859_v36, 0  ;;  %v921_v49 = vsel %vm2617_vm7, %v3232_v56, 0 }
 0x137   : > { %4454 = vst [vmem:[#allocation23_spill] sm:$0xff] %v3244_v43  ;;  %v896_v12 = vsel %vm2562_vm3, %v858_v53, 0  ;;  %v1385_v42 = vunpack.c.l.b16 %v920_v0  ;;  %v1386_v20 = vunpack.c.l.b16 %v921_v49  ;;  %v3262_v63 = vpack.c.bf16 %v3116_v61, %v3116_v61 }
 0x138   : > { %v3246_v24 = vpop.permute.xlu1 %1483  ;;  %v3268_v57 = vmax.f32 %v522_v18, 0.0  ;;  %v523_v11 = vadd.f32 %v2545_v50, %v488_v19  ;;  %v988_v26 = vunpack.c.l.b16 %v744_v47  ;;  %v524_v14 = vadd.f32 %v2545_v50, %v489_v34  ;;  %v2314_v50 = vld [vmem:[%s4381_s2] ss:$0 sm:$0xff] }
 0x139   : > { %4455 = vst [vmem:[#allocation24_spill] sm:$0xff] %v3246_v24  ;;  %v3271_v53 = vpack.c.b16 %v1386_v20, %v1385_v42  ;;  %v989_v9 = vunpack.c.l.b16 %v745_v10  ;;  %v1164_v38 = vunpack.c.l.b16 %v896_v12  ;;  %v1165_v36 = vunpack.c.l.b16 %v897_v46 }
 0x13a   : > { %1489 = vrot.lane.b32.xlu2 %v1087_v16, %s2386_s15  ;;  %1491 = vrot.lane.b32.xlu0 %v3248_v28, %s2386_s15  ;;  %v3278_v6 = vpack.c.bf16 %v3221_v41, %v3221_v41  ;;  %v3281_v24 = vmax.f32 %v540_v44, 0.0  ;;  %v490_v19 = vmul.f32 %v2314_v50, %v2940_v60  ;;  %v4457_v34 = vrot.slane %v3095_v58, 7 }
 0x13b   : > { %4456 = vst [vmem:[#allocation25_spill] sm:$0xff] %v3271_v53  ;;  %v4458_v10 = vrot.slane %v2990_v22, 7  ;;  %v3305_v60 = vpack.c.bf16 %v3268_v57, %v3268_v57  ;;  %v3308_v20 = vmax.f32 %v523_v11, 0.0 }
 0x13c   : > { %v3274_v0 = vpop.permute.xlu2 %1112  ;;  %v1242_v49 = vpop.permute.xlu0 %1241  ;;  %v3322_v11 = vpack.c.bf16 %v3281_v24, %v3281_v24 }
 0x13d   : > { %v1621_v47 = vsel %vm1617_vm13, %v3082_v30, %v1242_v49  ;;  %v669_v44 = vsel %vm646_vm4, %v4458_v10, %v4457_v34  ;;  %v4459_v46 = vmov %v4458_v10  ;;  %v4460_v30 = vrot.slane %v2913_v55, 7 }
 0x13e   : > { %1116 = vrot.lane.b32.xlu1 %v1087_v16, %s2382_s8  ;;  %v4406_v16 = vrot.slane %v3268_v57, 7  ;;  %v3310_v49 = vmax.f32 %v524_v14, 0.0  ;;  %v492_v34 = vmul.f32 %v2314_v50, %v3028_v45  ;;  %v3313_v10 = vpack.c.b16 %v989_v9, %v988_v26  ;;  %v2315_v45 = vld [vmem:[%s4382_s3] ss:$0 sm:$0xff] }
 0x13f   : > { %v670_v12 = vsel %vm646_vm4, %v4460_v30, %v4459_v46  ;;  %v3315_v55 = vpack.c.b16 %v1165_v36, %v1164_v38  ;;  %v491_v46 = vmul.f32 %v2314_v50, %v2978_v2  ;;  %v690_v42 = vpack.c.bf16 %v669_v44, %v669_v44 }
 0x140   : > { %v1354_v22 = vpop.permute.xlu1 %1353  ;;  %4461 = vst [vmem:[#allocation26_spill] sm:$0xff] %v3313_v10  ;;  %v689_v18 = vpack.c.bf16 %v670_v12, %v670_v12  ;;  %v525_v9 = vadd.f32 %v2315_v45, %v490_v19  ;;  %v3335_v38 = vpack.c.bf16 %v3308_v20, %v3308_v20  ;;  %v3346_v19 = vpack.c.bf16 %v3310_v49, %v3310_v49 }
 0x141   : > { %4462 = vst [vmem:[#allocation27_spill] sm:$0xff] %v3315_v55  ;;  %v1654_v30 = vsel %vm1650_vm14, %v1621_v47, %v1354_v22  ;;  %v3341_v47 = vpack.c.bf16 %v3144_v52, %v3144_v52  ;;  %v527_v44 = vadd.f32 %v2315_v45, %v492_v34  ;;  %v526_v36 = vadd.f32 %v2315_v45, %v491_v46 }
 0x142   : > { %1263 = vrot.lane.b32.xlu2 %v3313_v10, %s2387_s16  ;;  %1212 = vrot.lane.b32.xlu0 %v3315_v55, %s2383_s9  ;;  %v728_v26 = vsel %vm2647_vm9, %v689_v18, 0  ;;  %v729_v43 = vsel %vm2562_vm3, %v690_v42, 0  ;;  %v3360_v14 = vpack.c.bf16 %v2964_v48, %v2964_v48  ;;  %v3362_v34 = vmax.f32 %v525_v9, 0.0 }
 0x143   : > { %v4465_v46 = vrot.slane %v3116_v61, 7  ;;  %v763_v42 = vsel %vm2562_vm3, %v3262_v63, 0  ;;  %v764_v45 = vsel %vm2562_vm3, %v3305_v60, 0  ;;  %v4467_v50 = vrot.slane %v3095_v58, 7 }
 0x144   : > { %v3348_v12 = vpop.permute.xlu0 %1443  ;;  %v3350_v22 = vpop.permute.xlu2 %1504  ;;  %v3388_v4 = vpack.c.bf16 %v3362_v34, %v3362_v34  ;;  %v3390_v53 = vmax.f32 %v526_v36, 0.0 }
 0x145   : > { %4463 = vst [vmem:[#allocation28_spill] sm:$0xff] %v3348_v12  ;;  %v667_v18 = vsel %vm646_vm4, %v4465_v46, %v4406_v16  ;;  %v4466_v9 = vmov %v4465_v46  ;;  %v3384_v12 = vmax.f32 %v527_v44, 0.0  ;;  %v972_v46 = vunpack.c.l.b16 %v728_v26 }
 0x146   : > { %4464 = vst [vmem:[#allocation29_spill] sm:$0xff] %v3350_v22  ;;  %1447 = vrot.lane.b32.xlu1 %v3313_v10, %s2385_s14  ;;  %v668_v2 = vsel %vm646_vm4, %v4467_v50, %v4466_v9  ;;  %v692_v10 = vpack.c.bf16 %v667_v18, %v667_v18  ;;  %v973_v16 = vunpack.c.l.b16 %v729_v43  ;;  %v1054_v50 = vunpack.c.l.b16 %v763_v42 }
 0x147   : > { %v691_v22 = vpack.c.bf16 %v668_v2, %v668_v2  ;;  %4468 = vst [vmem:[#allocation30_spill] sm:$0xff] %v3388_v4  ;;  %v1055_v26 = vunpack.c.l.b16 %v764_v45  ;;  %v4469_v43 = vrot.slane %v3024_v13, 7  ;;  %v4470_v2 = vrot.slane %v3004_v17, 7 }
 0x148   : > { %v1095_v37 = vpop.permute.xlu1 %1094  ;;  %v731_v58 = vsel %vm2562_vm3, %v692_v10, 0  ;;  %v3410_v42 = vpack.c.bf16 %v3390_v53, %v3390_v53  ;;  %v4485_v4 = vrot.slane %v3116_v61, 1 }
 0x149   : > { %v652_v36 = vsel %vm646_vm4, %v4470_v2, %v4469_v43  ;;  %v730_v44 = vsel %vm2647_vm9, %v691_v22, 0  ;;  %v975_v23 = vunpack.c.l.b16 %v731_v58  ;;  %v3414_v43 = vpack.c.b16 %v973_v16, %v972_v46 }
 0x14a   : > { %1210 = vrot.lane.b32.xlu2 %v3114_v5, %s2383_s9  ;;  %1510 = vrot.lane.b32.xlu0 %v3315_v55, %s2388_s17  ;;  %v974_v9 = vunpack.c.l.b16 %v730_v44  ;;  %4471 = vst [vmem:[#allocation31_spill] sm:$0xff] %v3410_v42  ;;  %v4472_v58 = vrot.slane %v3140_v54, 7  ;;  %v4473_v44 = vrot.slane %v3024_v13, 7  ;;  %v707_v18 = vpack.c.bf16 %v652_v36, %v652_v36 }
 0x14b   : > { %v3429_v17 = vpack.c.b16 %v1055_v26, %v1054_v50  ;;  %v4475_v16 = vrot.slane %v3140_v54, 1  ;;  %v4477_v46 = vrot.slane %v3024_v13, 1  ;;  %v762_v50 = vsel %vm2562_vm3, %v3126_v15, 0 }
 0x14c   : > { %v1260_v35 = vpop.permute.xlu0 %1259  ;;  %v1391_v55 = vpop.permute.xlu2 %1390  ;;  %v651_v10 = vsel %vm646_vm4, %v4473_v44, %v4472_v58  ;;  %v781_v26 = vsel %vm2562_vm3, %v3278_v6, 0  ;;  %v3452_v58 = vpack.c.b16 %v975_v23, %v974_v9  ;;  %v1329_v44 = vunpack.c.l.b16 %v3108_v29 }
 0x14d   : > { %v1639_v22 = vsel %vm1617_vm13, %v3207_v51, %v1260_v35  ;;  %v3419_v2 = vsel %vm1683_vm15, %v1654_v30, %v1391_v55  ;;  %v761_v35 = vsel %vm2562_vm3, %v3093_v31, 0  ;;  %v4474_v51 = vrot.slane %v3221_v41, 1 }
 0x14e   : > { %1412 = vrot.lane.b32.xlu1 %v3177_v27, %s2384_s13  ;;  %v4476_v30 = vmov %v4475_v16  ;;  %4478 = vst [vmem:[#allocation32_spill] sm:$0xff] %v3452_v58  ;;  %v782_v13 = vsel %vm2562_vm3, %v3322_v11, 0  ;;  %v4483_v9 = vrot.slane %v3140_v54, 7  ;;  %v1053_v31 = vunpack.c.l.b16 %v762_v50 }
 0x14f   : > { %v819_v55 = vsel %vm815_vm5, %v4475_v16, %v4474_v51  ;;  %v820_v36 = vsel %vm815_vm5, %v4477_v46, %v4476_v30  ;;  %v1330_v16 = vunpack.c.l.b16 %v3151_v25  ;;  %v4480_v30 = vrot.slane %v3281_v24, 7 }
 0x150   : > { %v3455_v51 = vpop.permute.xlu1 %1467  ;;  %v4481_v46 = vrot.slane %v3221_v41, 7  ;;  %v877_v27 = vpack.c.bf16 %v819_v55, %v819_v55  ;;  %v1052_v25 = vunpack.c.l.b16 %v761_v35  ;;  %v1073_v42 = vunpack.c.l.b16 %v782_v13 }
 0x151   : > { %4479 = vst [vmem:[#allocation33_spill] sm:$0xff] %v3455_v51  ;;  %v876_v51 = vpack.c.bf16 %v820_v36, %v820_v36  ;;  %v4484_v54 = vrot.slane %v3268_v57, 1  ;;  %v3483_v36 = vpack.c.b16 %v1330_v16, %v1329_v44  ;;  %v751_v16 = vsel %vm2805_vm11, %v3341_v47, 0 }
 0x152   : > { %v649_v45 = vsel %vm646_vm4, %v4481_v46, %v4480_v30  ;;  %v4482_v23 = vmov %v4481_v46  ;;  %1508 = vrot.lane.b32.xlu2 %v3114_v5, %s2388_s17  ;;  %1102 = vrot.lane.b32.xlu0 %v3429_v17, %s2382_s8  ;;  %v1072_v30 = vunpack.c.l.b16 %v781_v26  ;;  %v708_v46 = vpack.c.bf16 %v651_v10, %v651_v10 }
 0x153   : > { %v650_v29 = vsel %vm646_vm4, %v4483_v9, %v4482_v23  ;;  %v710_v15 = vpack.c.bf16 %v649_v45, %v649_v45  ;;  %v836_v55 = vsel %vm815_vm5, %v4485_v4, %v4484_v54  ;;  %v1544_v45 = vsel %vm331_vm1, %v2675_v32, %v1095_v37 }
 0x154   : > { %v709_v58 = vpack.c.bf16 %v650_v29, %v650_v29  ;;  %v3489_v35 = vpop.permute.xlu2 %1522  ;;  %v1207_v50 = vpop.permute.xlu0 %1206  ;;  %v4487_v10 = vrot.slane %v3308_v20, 1  ;;  %v4488_v26 = vmov %v4484_v54  ;;  %v914_v32 = vsel %vm2562_vm3, %v876_v51, 0 }
 0x155   : > { %4486 = vst [vmem:[#allocation34_spill] sm:$0xff] %v3489_v35  ;;  %v749_v4 = vsel %vm2562_vm3, %v710_v15, 0  ;;  %v3500_v13 = vsel %vm1584_vm12, %v1544_v45, %v1207_v50  ;;  %v915_v37 = vsel %vm2617_vm7, %v877_v27, 0  ;;  %v752_v15 = vsel %vm2805_vm11, %v3360_v14, 0 }
 0x156   : > { %v748_v5 = vsel %vm2647_vm9, %v709_v58, 0  ;;  %v835_v61 = vsel %vm815_vm5, %v4488_v26, %v4487_v10  ;;  %v993_v58 = vunpack.c.l.b16 %v749_v4  ;;  %1431 = vrot.lane.b32.xlu1 %v3414_v43, %s2385_s14  ;;  %v860_v23 = vpack.c.bf16 %v836_v55, %v836_v55 }
 0x157   : > { %v992_v44 = vunpack.c.l.b16 %v748_v5  ;;  %v3516_v9 = vsel %vm2647_vm9, %v707_v18, 0  ;;  %v1079_v51 = vpack.c.b16 %v1053_v31, %v1052_v25  ;;  %v861_v29 = vpack.c.bf16 %v835_v61, %v835_v61 }
 0x158   : > { %v3520_v27 = vsel %vm2562_vm3, %v708_v46, 0  ;;  %v1372_v5 = vpop.permute.xlu1 %1371  ;;  %v3524_v45 = vpack.c.b16 %v1073_v42, %v1072_v30  ;;  %v1182_v50 = vunpack.c.l.b16 %v914_v32  ;;  %v1183_v10 = vunpack.c.l.b16 %v915_v37 }
 0x159   : > { %v3522_v54 = vpack.c.b16 %v993_v58, %v992_v44  ;;  %v4489_v26 = vrot.slane %v3390_v53, 1  ;;  %v4490_v55 = vrot.slane %v3362_v34, 1  ;;  %v1672_v31 = vsel %vm1650_vm14, %v1639_v22, %v1372_v5 }
 0x15a   : > { %v1042_v25 = vunpack.c.l.b16 %v751_v16  ;;  %v1043_v61 = vunpack.c.l.b16 %v752_v15  ;;  %v4491_v46 = vrot.slane %v3384_v12, 1  ;;  %v3542_v44 = vpack.c.bf16 %v3384_v12, %v3384_v12  ;;  %1100 = vrot.lane.b32.xlu2 %v1079_v51, %s2382_s8  ;;  %1120 = vrot.lane.b32.xlu0 %v3524_v45, %s2382_s8 }
 0x15b   : > { %v832_v18 = vsel %vm815_vm5, %v4490_v55, %v4489_v26  ;;  %v4492_v4 = vmov %v4489_v26  ;;  %v3546_v32 = vpack.c.bf16 %v3097_v59, %v3097_v59  ;;  %v898_v22 = vsel %vm2562_vm3, %v860_v23, 0 }
 0x15c   : > { %v831_v42 = vsel %vm815_vm5, %v4492_v4, %v4491_v46  ;;  %v899_v58 = vsel %vm2617_vm7, %v861_v29, 0  ;;  %v990_v16 = vunpack.c.l.b16 %v3516_v9  ;;  %v864_v15 = vpack.c.bf16 %v832_v18, %v832_v18  ;;  %v1409_v26 = vpop.permute.xlu2 %1408  ;;  %v1225_v55 = vpop.permute.xlu0 %1224 }
 0x15d   : > { %v1571_v5 = vsel %vm331_vm1, %v2724_v21, %v3274_v0  ;;  %v3560_v46 = vpack.c.b16 %v1183_v10, %v1182_v50  ;;  %v991_v4 = vunpack.c.l.b16 %v3520_v27  ;;  %v865_v30 = vpack.c.bf16 %v831_v42, %v831_v42 }
 0x15e   : > { %v3564_v23 = vsel %vm1683_vm15, %v1672_v31, %v1409_v26  ;;  %v3567_v37 = vsel %vm1584_vm12, %v1571_v5, %v1225_v55  ;;  %v1074_v29 = vpack.c.b16 %v1043_v61, %v1042_v25  ;;  %v1166_v9 = vunpack.c.l.b16 %v898_v22 }
 0x15f   : > { %1528 = vrot.lane.b32.xlu1 %v3560_v46, %s2388_s17  ;;  %v1167_v18 = vunpack.c.l.b16 %v899_v58  ;;  %v765_v21 = vsel %vm2562_vm3, %v3335_v38, 0  ;;  %v766_v0 = vsel %vm2562_vm3, %v3346_v19, 0  ;;  %v1313_v27 = vunpack.c.l.b16 %v3262_v63 }
 0x160   : > { %v902_v50 = vsel %vm2562_vm3, %v864_v15, 0  ;;  %v1314_v10 = vunpack.c.l.b16 %v3305_v60  ;;  %v4493_v31 = vrot.slane %v3310_v49, 7  ;;  %v4494_v25 = vrot.slane %v3308_v20, 7  ;;  %v3593_v63 = vpop.permute.xlu1 %1485 }
 0x161   : > { %v4496_v22 = vrot.slane %v3268_v57, 7  ;;  %4497 = vst [vmem:[#allocation35_spill] sm:$0xff] %v3593_v63  ;;  %v903_v15 = vsel %vm2617_vm7, %v865_v30, 0  ;;  %v4498_v60 = vrot.slane %v3310_v49, 1  ;;  %v4499_v5 = vrot.slane %v3308_v20, 1 }
 0x162   : > { %v665_v61 = vsel %vm646_vm4, %v4494_v25, %v4493_v31  ;;  %v4495_v42 = vmov %v4494_v25  ;;  %v886_v57 = vsel %vm2805_vm11, %v3225_v8, 0  ;;  %v887_v25 = vsel %vm2805_vm11, %v3232_v56, 0  ;;  %1473 = vrot.lane.b32.xlu2 %v1079_v51, %s2386_s15  ;;  %1090 = vrot.lane.b32.xlu0 %v1074_v29, %s2382_s8 }
 0x163   : > { %v666_v58 = vsel %vm646_vm4, %v4496_v22, %v4495_v42  ;;  %v834_v26 = vsel %vm815_vm5, %v4499_v5, %v4498_v60  ;;  %v694_v31 = vpack.c.bf16 %v665_v61, %v665_v61  ;;  %v4500_v42 = vrot.slane %v3362_v34, 1 }
 0x164   : > { %v693_v55 = vpack.c.bf16 %v666_v58, %v666_v58  ;;  %v4501_v30 = vmov %v4498_v60  ;;  %v3615_v22 = vpack.c.b16 %v1314_v10, %v1313_v27  ;;  %v1056_v61 = vunpack.c.l.b16 %v765_v21  ;;  %v3623_v63 = vpop.permute.xlu2 %1373  ;;  %v1428_v27 = vpop.permute.xlu0 %1427 }
 0x165   : > { %v833_v20 = vsel %vm815_vm5, %v4501_v30, %v4500_v42  ;;  %v1057_v8 = vunpack.c.l.b16 %v766_v0  ;;  %v1170_v58 = vunpack.c.l.b16 %v902_v50  ;;  %v1171_v60 = vunpack.c.l.b16 %v903_v15 }
 0x166   : > { %v862_v5 = vpack.c.bf16 %v834_v26, %v834_v26  ;;  %v732_v56 = vsel %vm2647_vm9, %v693_v55, 0  ;;  %v733_v35 = vsel %vm2562_vm3, %v694_v31, 0  ;;  %v3625_v10 = vpack.c.b16 %v1167_v18, %v1166_v9 }
 0x167   : > { %v863_v51 = vpack.c.bf16 %v833_v20, %v833_v20  ;;  %v976_v42 = vunpack.c.l.b16 %v732_v56  ;;  %v977_v29 = vunpack.c.l.b16 %v733_v35  ;;  %v630_v21 = vrot.slane %v3384_v12, 7 }
 0x168   : > { %v3630_v0 = vsel %vm1716_vm2, %v3419_v2, %v1428_v27  ;;  %v3632_v50 = vpack.c.b16 %v991_v4, %v990_v16  ;;  %v3634_v15 = vunpack.c.l.b16 %v886_v57  ;;  %1214 = vrot.lane.b32.xlu1 %v3625_v10, %s2383_s9  ;;  %v3638_v26 = vpack.c.b16 %v1057_v8, %v1056_v61  ;;  %v1356_v57 = vpop.permute.xlu1 %1355 }
 0x169   : > { %v3640_v9 = vunpack.c.l.b16 %v887_v25  ;;  %v4502_v18 = vrot.slane %v2566_v3, 1  ;;  %v4503_v35 = vrot.slane %v3097_v59, 1  ;;  %v3650_v2 = vpack.c.b16 %v977_v29, %v976_v42 }
 0x16a   : > { %v3652_v16 = vpack.c.b16 %v1171_v60, %v1170_v58  ;;  %v3656_v4 = vsel %vm2562_vm3, %v862_v5, 0  ;;  %v769_v31 = vsel %vm2562_vm3, %v3542_v44, 0  ;;  %v770_v3 = vsel %vm2562_vm3, %v3546_v32, 0  ;;  %1118 = vrot.lane.b32.xlu2 %v3248_v28, %s2382_s8  ;;  %1239 = vrot.lane.b32.xlu0 %v3018_v39, %s2387_s16 }
 0x16b   : > { %v3648_v55 = vsel %vm815_vm5, %v4503_v35, %v4502_v18  ;;  %v3666_v25 = vsel %vm2617_vm7, %v863_v51, 0  ;;  %v4504_v30 = vrot.slane %v3144_v52, 1  ;;  %v4505_v20 = vrot.slane %v3281_v24, 1 }
 0x16c   : > { %v4507_v58 = vrot.slane %v3221_v41, 1  ;;  %v4508_v5 = vrot.slane %v2964_v48, 7  ;;  %v4509_v56 = vrot.slane %v3144_v52, 7  ;;  %v4511_v18 = vrot.slane %v3281_v24, 7 }
 0x16d   : > { %v817_v61 = vsel %vm815_vm5, %v4505_v20, %v4504_v30  ;;  %v4506_v8 = vmov %v4505_v20  ;;  %v4512_v48 = vrot.slane %v3390_v53, 7  ;;  %v1331_v24 = vunpack.c.l.b16 %v3278_v6 }
 0x16e   : > { %v818_v60 = vsel %vm815_vm5, %v4507_v58, %v4506_v8  ;;  %v647_v27 = vsel %vm646_vm4, %v4509_v56, %v4508_v5  ;;  %v879_v42 = vpack.c.bf16 %v817_v61, %v817_v61  ;;  %v4510_v29 = vmov %v4509_v56  ;;  %v1244_v58 = vpop.permute.xlu0 %1243 }
 0x16f   : > { %v878_v51 = vpack.c.bf16 %v818_v60, %v818_v60  ;;  %v648_v35 = vsel %vm646_vm4, %v4511_v18, %v4510_v29  ;;  %v680_v41 = vpack.c.bf16 %v647_v27, %v647_v27  ;;  %v3702_v30 = vsel %vm646_vm4, %v4512_v48, %v630_v21  ;;  %v3714_v60 = vpop.permute.xlu2 %1506 }
 0x170   : > { %v679_v52 = vpack.c.bf16 %v648_v35, %v648_v35  ;;  %v1332_v20 = vunpack.c.l.b16 %v3322_v11  ;;  %v917_v28 = vsel %vm2617_vm7, %v879_v42, 0  ;;  %v1623_v27 = vsel %vm1617_vm13, %v3500_v13, %v1244_v58  ;;  %1104 = vrot.lane.b32.xlu1 %v3638_v26, %s2382_s8 }
 0x171   : > { %v916_v61 = vsel %vm2562_vm3, %v878_v51, 0  ;;  %v919_v39 = vsel %vm2562_vm3, %v680_v41, 0  ;;  %v719_v8 = vsel %vm2805_vm11, %v680_v41, 0  ;;  %v1185_v56 = vunpack.c.l.b16 %v917_v28 }
 0x172   : > { %v1184_v5 = vunpack.c.l.b16 %v916_v61  ;;  %v918_v6 = vsel %vm2647_vm9, %v679_v52, 0  ;;  %v1237_v11 = vunpack.c.l.b16 %v919_v39  ;;  %v3720_v42 = vpack.c.b16 %v1332_v20, %v1331_v24  ;;  %1449 = vrot.lane.b32.xlu2 %v3632_v50, %s2385_s14  ;;  %1218 = vrot.lane.b32.xlu0 %v3652_v16, %s2383_s9 }
 0x173   : > { %v1236_v51 = vunpack.c.l.b16 %v918_v6  ;;  %v718_v29 = vsel %vm2805_vm11, %v679_v52, 0  ;;  %v1656_v18 = vsel %vm1650_vm14, %v1623_v27, %v1356_v57  ;;  %v3731_v48 = vunpack.c.l.b16 %v719_v8  ;;  %v3748_v8 = vpop.permute.xlu1 %1096 }
 0x174   : > { %v3727_v35 = vpack.c.b16 %v1185_v56, %v1184_v5  ;;  %v3729_v41 = vunpack.c.l.b16 %v718_v29  ;;  %v4513_v13 = vrot.slane %v3390_v53, 7  ;;  %v4514_v24 = vrot.slane %v3362_v34, 7 }
 0x175   : > { %v3733_v61 = vpack.c.b16 %v1237_v11, %v1236_v51  ;;  %v4516_v28 = vrot.slane %v3310_v49, 7  ;;  %v1315_v39 = vunpack.c.l.b16 %v3335_v38  ;;  %v1316_v56 = vunpack.c.l.b16 %v3346_v19 }
 0x176   : > { %v663_v52 = vsel %vm646_vm4, %v4514_v24, %v4513_v13  ;;  %v4515_v20 = vmov %v4514_v24  ;;  %v994_v58 = vpack.c.b16 %v3731_v48, %v3729_v41  ;;  %v1168_v6 = vunpack.c.l.b16 %v3656_v4  ;;  %v4534_v48 = vld [vmem:[#allocation22_spill] sm:$0xff] }
 0x177   : > { %v664_v57 = vsel %vm646_vm4, %v4516_v28, %v4515_v20  ;;  %v696_v5 = vpack.c.bf16 %v663_v52, %v663_v52  ;;  %v1060_v11 = vunpack.c.l.b16 %v769_v31  ;;  %v1061_v34 = vunpack.c.l.b16 %v770_v3  ;;  %v3779_v52 = vpop.permute.xlu0 %1114 }
 0x178   : > { %v695_v53 = vpack.c.bf16 %v664_v57, %v664_v57  ;;  %v4517_v49 = vrot.slane %v3097_v59, 1  ;;  %v4518_v27 = vrot.slane %v3384_v12, 1  ;;  %v4519_v51 = vrot.slane %v3097_v59, 7  ;;  %v1393_v12 = vpop.permute.xlu2 %1392 }
 0x179   : > { %v735_v31 = vsel %vm2562_vm3, %v696_v5, 0  ;;  %v3774_v3 = vpack.c.b16 %v1316_v56, %v1315_v39  ;;  %v1169_v29 = vunpack.c.l.b16 %v3666_v25  ;;  %v697_v13 = vpack.c.bf16 %v3702_v30, %v3702_v30  ;;  %v4521_v5 = vld [vmem:[#allocation31_spill] sm:$0xff] }
 0x17a   : > { %v830_v38 = vsel %vm815_vm5, %v4518_v27, %v4517_v49  ;;  %v661_v19 = vsel %vm646_vm4, %v630_v21, %v4519_v51  ;;  %v734_v4 = vsel %vm2647_vm9, %v695_v53, 0  ;;  %v979_v59 = vunpack.c.l.b16 %v735_v31 }
 0x17b   : > { %v978_v24 = vunpack.c.l.b16 %v734_v4  ;;  %v1186_v62 = vpack.c.b16 %v3640_v9, %v3634_v15  ;;  %v866_v21 = vpack.c.bf16 %v830_v38, %v830_v38  ;;  %v3784_v20 = vsel %vm1683_vm15, %v1656_v18, %v1393_v12  ;;  %v4520_v9 = vld [vmem:[#allocation30_spill] sm:$0xff]  ;;  %v1470_v49 = vpop.permute.xlu1 %1469 }
 0x17c   : > { %v698_v28 = vpack.c.bf16 %v661_v19, %v661_v19  ;;  %v867_v57 = vpack.c.bf16 %v3648_v55, %v3648_v55  ;;  %vm1749_vm4 = vcmask 457728   ;;  %v3791_v30 = vpack.c.b16 %v1061_v34, %v1060_v11 }
 0x17d   : > { %v3788_v25 = vpack.c.b16 %v979_v59, %v978_v24  ;;  %1202 = vrot.lane.b32.xlu1 %v1186_v62, %s2383_s9  ;;  %v1319_v39 = vunpack.c.l.b16 %v3542_v44  ;;  %v1320_v53 = vunpack.c.l.b16 %v3546_v32  ;;  %v3795_v15 = vpack.c.b16 %v1169_v29, %v1168_v6 }
 0x17e   : > { %v767_v18 = vsel %vm2562_vm3, %v4520_v9, 0  ;;  %v768_v55 = vsel %vm2562_vm3, %v4521_v5, 0  ;;  %v736_v56 = vsel %vm2647_vm9, %v697_v13, 0  ;;  %v924_v44 = vsel %vm2562_vm3, %v3341_v47, 0  ;;  %1108 = vrot.lane.b32.xlu0 %v3791_v30, %s2382_s8 }
 0x17f   : > { %v925_v32 = vsel %vm2562_vm3, %v3360_v14, 0  ;;  %v1333_v6 = vunpack.c.l.b16 %v3341_v47  ;;  %v1334_v11 = vunpack.c.l.b16 %v3360_v14  ;;  %v3815_v34 = vsel %vm1749_vm4, %v3630_v0, %v1470_v49  ;;  %1216 = vrot.lane.b32.xlu2 %v3795_v15, %s2383_s9  ;;  %v1446_v51 = vpop.permute.xlu0 %1445 }
 0x180   : > { %v737_v7 = vsel %vm2562_vm3, %v698_v28, 0  ;;  %v3819_v27 = vunpack.c.l.b16 %v924_v44  ;;  %v3821_v38 = vunpack.c.l.b16 %v925_v32  ;;  %v1343_v14 = vpack.c.b16 %v1320_v53, %v1319_v39  ;;  %v3831_v19 = vpop.permute.xlu2 %1357  ;;  %v4523_v44 = vld [vmem:[#allocation16_spill] sm:$0xff] }
 0x181   : > { %v3827_v47 = vpack.c.b16 %v1334_v11, %v1333_v6  ;;  %v1058_v4 = vunpack.c.l.b16 %v767_v18  ;;  %v1059_v31 = vunpack.c.l.b16 %v768_v55  ;;  %v980_v29 = vunpack.c.l.b16 %v736_v56  ;;  %v4522_v56 = vld [vmem:[#allocation14_spill] sm:$0xff] }
 0x182   : > { %v1465_v0 = vpack.c.b16 %v3821_v38, %v3819_v27  ;;  %v981_v13 = vunpack.c.l.b16 %v737_v7  ;;  %v1738_v24 = vsel %vm1716_vm2, %v3564_v23, %v1446_v51  ;;  %v904_v59 = vsel %vm2562_vm3, %v866_v21, 0  ;;  %v4531_v27 = vld [vmem:[#allocation25_spill] sm:$0xff] }
 0x183   : > { %v905_v12 = vsel %vm2617_vm7, %v867_v57, 0  ;;  %v1488_v62 = vpop.permute.xlu1 %1487  ;;  %v3840_v28 = vpack.c.b16 %v1059_v31, %v1058_v4  ;;  %v1172_v53 = vunpack.c.l.b16 %v904_v59  ;;  %v1317_v1 = vunpack.c.l.b16 %v4520_v9  ;;  %v4524_v31 = vld [vmem:[#allocation27_spill] sm:$0xff] }
 0x184   : > { %v3842_v39 = vpack.c.b16 %v981_v13, %v980_v29  ;;  %v1173_v18 = vunpack.c.l.b16 %v905_v12  ;;  %v3845_v55 = vsel %vm1749_vm4, %v1738_v24, %v1488_v62  ;;  %v1318_v40 = vunpack.c.l.b16 %v4521_v5  ;;  %v4525_v29 = vld [vmem:[#allocation9_spill] sm:$0xff]  ;;  %v4526_v24 = vld [vmem:[#allocation19_spill] sm:$0xff] }
 0x185   : > { %1367 = vrot.lane.b32.xlu1 %v1343_v14, %s2381_s29  ;;  %v1311_v49 = vunpack.c.l.b16 %v4522_v56  ;;  %v1312_v32 = vunpack.c.l.b16 %v4523_v44  ;;  %vm1782_vm3 = vcmask 523264  }
 0x186   : > { %1255 = vrot.lane.b32.xlu0 %v3842_v39, %s2387_s16  ;;  %v3853_v57 = vpack.c.b16 %v1173_v18, %v1172_v53  ;;  %v3857_v6 = vpack.c.b16 %v1318_v40, %v1317_v1  ;;  %v4527_v53 = vld [vmem:[#allocation32_spill] sm:$0xff]  ;;  %v4528_v40 = vld [vmem:[#allocation10_spill] sm:$0xff] }
 0x187   : > { %1106 = vrot.lane.b32.xlu2 %v3840_v28, %s2382_s8  ;;  %v1411_v23 = vpop.permute.xlu0 %1410  ;;  %v1339_v7 = vpack.c.b16 %v1312_v32, %v1311_v49  ;;  %v4529_v32 = vld [vmem:[#allocation20_spill] sm:$0xff] }
 0x188   : > { %v1099_v21 = vpop.permute.xlu2 %1098 }
 0x18b   : > { %v1262_v11 = vpop.permute.xlu1 %1261 }
 0x18c   : > { %v1641_v9 = vsel %vm1617_vm13, %v3567_v37, %v1262_v11  ;;  %v1547_v37 = vsel %vm331_vm1, %v4525_v29, %v3748_v8 }
 0x18d   : > { %1220 = vrot.lane.b32.xlu1 %v3853_v57, %s2383_s9  ;;  %v1674_v5 = vsel %vm1650_vm14, %v1641_v9, %v3623_v63 }
 0x18e   : > { %1359 = vrot.lane.b32.xlu0 %v1339_v7, %s2381_s29  ;;  %v4530_v7 = vld [vmem:[#allocation11_spill] sm:$0xff] }
 0x18f   : > { %1404 = vrot.lane.b32.xlu2 %v3853_v57, %s2384_s13  ;;  %v1430_v14 = vpop.permute.xlu0 %1429 }
 0x190   : > { %v1525_v51 = vpop.permute.xlu2 %1524  ;;  %v1722_v4 = vsel %vm1716_vm2, %v3784_v20, %v1430_v14  ;;  %v1707_v20 = vsel %vm1683_vm15, %v1674_v5, %v1411_v23  ;;  %v1574_v23 = vsel %vm331_vm1, %v4528_v40, %v3779_v52  ;;  %v1550_v52 = vsel %vm331_vm1, %v4530_v7, %v1099_v21 }
 0x193   : > { %v1209_v13 = vpop.permute.xlu1 %1208 }
 0x194   : > { %v1592_v63 = vsel %vm1584_vm12, %v1547_v37, %v1209_v13  ;;  %v3940_v13 = vsel %vm1782_vm3, %v3845_v55, %v1525_v51  ;;  %v1823_v55 = vld [vmem:[%s4383_s4 + $0x20] sm:$0xf] }
 0x195   : > { %1396 = vrot.lane.b32.xlu1 %v4524_v31, %s2384_s13 }
 0x196   : > { %1441 = vrot.lane.b32.xlu0 %v4526_v24, %s2385_s14 }
 0x197   : > { %1247 = vrot.lane.b32.xlu2 %v3414_v43, %s2387_s16  ;;  %v1376_v59 = vpop.permute.xlu0 %1375 }
 0x198   : > { %v3880_v12 = vpop.permute.xlu2 %1489 }
 0x19b   : > { %v1472_v62 = vpop.permute.xlu1 %1471 }
 0x19c   : > { %v3886_v8 = vsel %vm1749_vm4, %v1722_v4, %v1472_v62 }
 0x19d   : > { %1512 = vrot.lane.b32.xlu1 %v3625_v10, %s2388_s17 }
 0x19e   : > { %1257 = vrot.lane.b32.xlu0 %v4526_v24, %s2387_s16 }
 0x19f   : > { %1433 = vrot.lane.b32.xlu2 %v4527_v53, %s2385_s14  ;;  %v1395_v1 = vpop.permute.xlu0 %1394 }
 0x1a0   : > { %v1264_v18 = vpop.permute.xlu2 %1263 }
 0x1a3   : > { %v1227_v56 = vpop.permute.xlu1 %1226 }
 0x1a4   : > { %v1610_v49 = vsel %vm1584_vm12, %v1574_v23, %v1227_v56  ;;  %v2251_v56 = vld [vmem:[%s4383_s4 + $0x10] sm:$0xff] }
 0x1a5   : > { %1377 = vrot.lane.b32.xlu1 %v3483_v36, %s2381_s29  ;;  %v1643_v44 = vsel %vm1617_vm13, %v1610_v49, %v1264_v18  ;;  %v3906_v36 = vsel %vm1782_vm3, %v3815_v34, %v3714_v60  ;;  %v2252_v18 = vld [vmem:[%s4383_s4 + $0x18] sm:$0xff] }
 0x1a6   : > { %1475 = vrot.lane.b32.xlu0 %v3429_v17, %s2386_s15  ;;  %v1676_v11 = vsel %vm1650_vm14, %v1643_v44, %v1376_v59 }
 0x1a7   : > { %1228 = vrot.lane.b32.xlu2 %v4529_v32, %s2383_s9  ;;  %v3911_v9 = vpop.permute.xlu0 %1526 }
 0x1a8   : > { %v1211_v5 = vpop.permute.xlu2 %1210 }
 0x1a9   : > { %v3914_v14 = vsel %vm1584_vm12, %v1550_v52, %v1211_v5 }
 0x1ab   : > { %v1246_v17 = vpop.permute.xlu1 %1245 }
 0x1ac   : > { %v1625_v4 = vsel %vm1617_vm13, %v1592_v63, %v1246_v17 }
 0x1ad   : > { %1493 = vrot.lane.b32.xlu1 %v3524_v45, %s2386_s15  ;;  %v1658_v60 = vsel %vm1650_vm14, %v1625_v4, %v3831_v19 }
 0x1ae   : > { %1265 = vrot.lane.b32.xlu0 %v3632_v50, %s2387_s16  ;;  %v1691_v34 = vsel %vm1683_vm15, %v1658_v60, %v1395_v1 }
 0x1af   : > { %1414 = vrot.lane.b32.xlu2 %v3560_v46, %s2384_s13  ;;  %v3926_v21 = vpop.permute.xlu0 %1491 }
 0x1b0   : > { %v1509_v31 = vpop.permute.xlu2 %1508 }
 0x1b1   : > { %v4007_v17 = vsel %vm1782_vm3, %v3886_v8, %v1509_v31 }
 0x1b3   : > { %v3930_v45 = vpop.permute.xlu1 %1116 }
 0x1b5   : > { %1361 = vrot.lane.b32.xlu1 %v3615_v22, %s2381_s29 }
 0x1b6   : > { %1451 = vrot.lane.b32.xlu0 %v3522_v54, %s2385_s14 }
 0x1b7   : > { %1530 = vrot.lane.b32.xlu2 %v3727_v35, %s2388_s17  ;;  %v1213_v29 = vpop.permute.xlu0 %1212 }
 0x1b8   : > { %v1101_v19 = vpop.permute.xlu2 %1100 }
 0x1b9   : > { %v1553_v37 = vsel %vm331_vm1, %v3414_v43, %v1101_v19 }
 0x1ba   : > { %v3943_v63 = vsel %vm1584_vm12, %v1553_v37, %v1213_v29 }
 0x1bb   : > { %v1448_v22 = vpop.permute.xlu1 %1447 }
 0x1bc   : > { %v1740_v24 = vsel %vm1716_vm2, %v1707_v20, %v1448_v22  ;;  %v4533_v22 = vld [vmem:[#allocation12_spill] sm:$0xff] }
 0x1bd   : > { %1477 = vrot.lane.b32.xlu1 %v3638_v26, %s2386_s15  ;;  %v1841_v26 = vunpack.c.l.b16 %v1823_v55  ;;  %v4536_v55 = vld [vmem:[#allocation7_spill] sm:$0xff] }
 0x1be   : > { %1249 = vrot.lane.b32.xlu0 %v4527_v53, %s2387_s16 }
 0x1bf   : > { %1398 = vrot.lane.b32.xlu2 %v3625_v10, %s2384_s13  ;;  %v3954_v59 = vpop.permute.xlu0 %1510  ;;  %v1846_v20 = vpack.c.b16 %v1841_v26, %v1841_v26 }
 0x1c0   : > { %v3952_v43 = vpop.permute.xlu2 %1473 }
 0x1c1   : > { %v1885_v10 = vsel %vm380_vm0, %v1846_v20, 0  ;;  %vm1851_vm0 = vcmask 588800  }
 0x1c2   : > { %1890 = vmatpush.bf16.msra.mxu1 %v1885_v10  ;;  %2255 = vmatpush.bf16.msra.mxu2 %v1885_v10 }
 0x1c3   : > { %v1413_v51 = vpop.permute.xlu1 %1412 }
 0x1c4   : > { %v1709_v62 = vsel %vm1683_vm15, %v1676_v11, %v1413_v51 }
 0x1c5   : > { %1267 = vrot.lane.b32.xlu1 %v3522_v54, %s2387_s16 }
 0x1c6   : > { %1435 = vrot.lane.b32.xlu0 %v3650_v2, %s2385_s14  ;;  %1891 = vmatpush.bf16.msra.mxu1 %v2252_v18 }
 0x1c7   : > { %1514 = vrot.lane.b32.xlu2 %v3795_v15, %s2388_s17  ;;  %v1103_v40 = vpop.permute.xlu0 %1102  ;;  %2256 = vmatpush.bf16.msra.mxu2 %v2252_v18 }
 0x1c8   : > { %v3970_v1 = vpop.permute.xlu2 %1118  ;;  %v1556_v23 = vsel %vm331_vm1, %v4527_v53, %v1103_v40  ;;  %v2250_v53 = vld [vmem:[%s4383_s4 + $0x8] sm:$0xff] }
 0x1c9   : > { %v4540_v40 = vld [vmem:[#allocation6_spill] sm:$0xff] }
 0x1ca   : > { %1892 = vmatpush.bf16.msra.mxu1 %v2251_v56 }
 0x1cb   : > { %v1432_v49 = vpop.permute.xlu1 %1431  ;;  %2257 = vmatpush.bf16.msra.mxu2 %v2251_v56  ;;  %v4541_v56 = vld [vmem:[#allocation18_spill] sm:$0xff] }
 0x1cc   : > { %v1724_v44 = vsel %vm1716_vm2, %v1691_v34, %v1432_v49  ;;  %v4542_v49 = vld [vmem:[#allocation23_spill] sm:$0xff] }
 0x1cd   : > { %1453 = vrot.lane.b32.xlu1 %v3733_v61, %s2385_s14 }
 0x1ce   : > { %1230 = vrot.lane.b32.xlu0 %v3560_v46, %s2383_s9  ;;  %1893 = vmatpush.bf16.msra.mxu1 %v2250_v53  ;;  %v2249_v46 = vld [vmem:[%s4383_s4] sm:$0xff] }
 0x1cf   : > { %1379 = vrot.lane.b32.xlu2 %v3720_v42, %s2381_s29  ;;  %v1121_v11 = vpop.permute.xlu0 %1120  ;;  %2258 = vmatpush.bf16.msra.mxu2 %v2250_v53  ;;  %v4543_v53 = vpack.c.b16 %v4541_v56, %v4542_v49 }
 0x1d0   : > { %v1450_v32 = vpop.permute.xlu2 %1449  ;;  %v3990_v52 = vsel %vm331_vm1, %v3522_v54, %v1121_v11  ;;  %v4544_v11 = vld [vmem:[#allocation5_spill] sm:$0xff] }
 0x1d1   : > { %v1742_v7 = vsel %vm1716_vm2, %v1709_v62, %v1450_v32  ;;  %v4539_v62 = vld [vmem:[#allocation29_spill] sm:$0xff]  ;;  %v1757_v32 = vsel %vm1749_vm4, %v1724_v44, %v3952_v43 }
 0x1d2   : > { %1894 = vmatpush.bf16.msra.mxu1 %v2249_v46 }
 0x1d3   : > { %v1529_v42 = vpop.permute.xlu1 %1528  ;;  %2259 = vmatpush.bf16.msra.mxu2 %v2249_v46  ;;  %v926_v46 = vsel %vm2805_vm11, %v4544_v11, 0 }
 0x1d5   : > { %1251 = vrot.lane.b32.xlu1 %v3650_v2, %s2387_s16 }
 0x1d6   : > { %1416 = vrot.lane.b32.xlu0 %v3727_v35, %s2384_s13 }
 0x1d7   : > { %1495 = vrot.lane.b32.xlu2 %v1465_v0, %s2386_s15  ;;  %v1091_v54 = vpop.permute.xlu0 %1090 }
 0x1d9   : > { %v4003_v5 = vpop.permute.xlu2 %1216 }
 0x1db   : > { %v1215_v4 = vpop.permute.xlu1 %1214 }
 0x1dc   : > { %v4012_v60 = vsel %vm1584_vm12, %v1556_v23, %v1215_v4  ;;  %v927_v23 = vsel %vm2805_vm11, %v4540_v40, 0 }
 0x1dd   : > { %1437 = vrot.lane.b32.xlu1 %v3788_v25, %s2385_s14 }
 0x1de   : > { %1532 = vrot.lane.b32.xlu0 %v4531_v27, %s2388_s17 }
 0x1df   : > { %1363 = vrot.lane.b32.xlu2 %v3774_v3, %s2381_s29  ;;  %v1240_v38 = vpop.permute.xlu0 %1239  ;;  %v1773_v3 = vsel %vm1749_vm4, %v1740_v24, %v3880_v12  ;;  %v4532_v12 = vld [vmem:[#allocation13_spill] sm:$0xff]  ;;  %v4535_v24 = vld [vmem:[#allocation8_spill] sm:$0xff] }
 0x1e0   : > { %v4030_v31 = vsel %vm1782_vm3, %v1773_v3, %v3911_v9  ;;  %v4537_v26 = vpack.c.b16 %v4535_v24, %v4536_v55  ;;  %v4548_v24 = vld [vmem:[#allocation21_spill] sm:$0xff] }
 0x1e1   : > { %v1107_v0 = vpop.permute.xlu2 %1106 }
 0x1e2   : > { %v1562_v33 = vsel %vm331_vm1, %v3788_v25, %v1107_v0 }
 0x1e3   : > { %v1105_v8 = vpop.permute.xlu1 %1104 }
 0x1e4   : > { %v1559_v34 = vsel %vm331_vm1, %v3650_v2, %v1105_v8  ;;  %v1538_v2 = vsel %vm331_vm1, %v994_v58, %v1091_v54  ;;  %v1790_v54 = vsel %vm1782_vm3, %v1757_v32, %v3954_v59 }
 0x1e5   : > { %1232 = vrot.lane.b32.xlu1 %v3727_v35, %s2383_s9 }
 0x1e6   : > { %1400 = vrot.lane.b32.xlu0 %v3795_v15, %s2384_s13 }
 0x1e7   : > { %1479 = vrot.lane.b32.xlu2 %v3840_v28, %s2386_s15  ;;  %v1219_v19 = vpop.permute.xlu0 %1218 }
 0x1e9   : > { %v1405_v29 = vpop.permute.xlu2 %1404 }
 0x1ed   : > { %1418 = vrot.lane.b32.xlu1 %v4531_v27, %s2384_s13  ;;  %v1464_v27 = vunpack.c.l.b16 %v927_v23 }
 0x1ee   : > { %1516 = vrot.lane.b32.xlu0 %v3652_v16, %s2388_s17 }
 0x1ef   : > { %v1203_v35 = vpop.permute.xlu1 %1202  ;;  %1269 = vrot.lane.b32.xlu2 %v3733_v61, %s2387_s16  ;;  %v4538_v61 = vld [vmem:[#allocation33_spill] sm:$0xff] }
 0x1f0   : > { %v1586_v15 = vsel %vm1584_vm12, %v1538_v2, %v1203_v35  ;;  %v1109_v37 = vpop.permute.xlu0 %1108  ;;  %v4545_v35 = vld [vmem:[#allocation24_spill] sm:$0xff] }
 0x1f1   : > { %v1619_v28 = vsel %vm1617_vm13, %v1586_v15, %v1240_v38  ;;  %v4056_v20 = vpop.permute.xlu2 %1247  ;;  %v1463_v38 = vunpack.c.l.b16 %v926_v46  ;;  %v4546_v15 = vld [vmem:[#allocation17_spill] sm:$0xff] }
 0x1f2   : > { %v1652_v9 = vsel %vm1650_vm14, %v1619_v28, %v4532_v12  ;;  %v1627_v56 = vsel %vm1617_vm13, %v3914_v14, %v4056_v20 }
 0x1f3   : > { %v1685_v41 = vsel %vm1683_vm15, %v1652_v9, %v4533_v22  ;;  %v1466_v3 = vpack.c.b16 %v1464_v27, %v1463_v38 }
 0x1f4   : > { %v1718_v58 = vsel %vm1716_vm2, %v1685_v41, %v4534_v48  ;;  %v4547_v48 = vld [vmem:[#allocation15_spill] sm:$0xff] }
 0x1f5   : > { %1534 = vrot.lane.b32.xlu1 %v4537_v26, %s2388_s17  ;;  %v1751_v51 = vsel %vm1749_vm4, %v1718_v58, %v4538_v61 }
 0x1f6   : > { %v1784_v10 = vsel %vm1782_vm3, %v1751_v51, %v4539_v62  ;;  %1381 = vrot.lane.b32.xlu0 %v3827_v47, %s2381_s29  ;;  %v1775_v47 = vsel %vm1749_vm4, %v1742_v7, %v3926_v21  ;;  %v4551_v51 = vld [vmem:[#allocation34_spill] sm:$0xff] }
 0x1f7   : > { %2227 = vmatmul.msk.bf16.vlgmr.msra.gmra.mxu1 %vm1851_vm0, %v1784_v10  ;;  %v1368_v18 = vpop.permute.xlu1 %1367  ;;  %1455 = vrot.lane.b32.xlu2 %v4543_v53, %s2385_s14  ;;  %v4082_v43 = vsel %vm1782_vm3, %v1775_v47, %v1529_v42 }
 0x1f8   : > { %v1256_v4 = vpop.permute.xlu0 %1255 }
 0x1f9   : > { %v1434_v2 = vpop.permute.xlu2 %1433 }
 0x1fd   : > { %1402 = vrot.lane.b32.xlu1 %v3652_v16, %s2384_s13  ;;  %v1602_v16 = vsel %vm1584_vm12, %v1562_v33, %v1219_v19  ;;  %s269_s13 = sand.u32 1, %s2370_s25  }
 0x1fe   : > { %1497 = vrot.lane.b32.xlu0 %v1466_v3, %s2386_s15  ;;  %v1635_v44 = vsel %vm1617_vm13, %v1602_v16, %v1256_v4  ;;  %s2111_s19 = scalar_lea.sflag [#allocation3], %s269_s13 }
 0x1ff   : > { %v1221_v8 = vpop.permute.xlu1 %1220  ;;  %1253 = vrot.lane.b32.xlu2 %v3788_v25, %s2387_s16  ;;  %v1668_v7 = vsel %vm1650_vm14, %v1635_v44, %v1368_v18  ;;  %s2192_s16 = sshll.u32 %s269_s13, 8 }
 0x200   : > { %v1360_v59 = vpop.permute.xlu0 %1359  ;;  %v1701_v42 = vsel %vm1683_vm15, %v1668_v7, %v1405_v29  ;;  %v1565_v29 = vsel %vm331_vm1, %v3842_v39, %v1109_v37  ;;  %v4550_v37 = vld [vmem:[#allocation35_spill] sm:$0xff]  ;;  %v4552_v7 = vld [vmem:[#allocation26_spill] sm:$0xff] }
 0x201   : > { %v1229_v25 = vpop.permute.xlu2 %1228  ;;  %v1604_v12 = vsel %vm1584_vm12, %v1565_v29, %v1221_v8  ;;  %v1660_v49 = vsel %vm1650_vm14, %v1627_v56, %v1360_v59  ;;  %v4196_v56 = vld [vmem:[%s4385_s6] ss:$0 sm:$0xff] }
 0x205   : > { %1518 = vrot.lane.b32.xlu1 %v3853_v57, %s2388_s17  ;;  %s4206_s17 = scalar_lea.vmem [#allocation2], %s2192_s16  ;;  %s2336_s16 = scalar_lea.hbm %s4386_s7, 512 }
 0x206   : > { %1365 = vrot.lane.b32.xlu0 %v3857_v6, %s2381_s29  ;;  %v4111_v6 = vsel %vm1584_vm12, %v1559_v34, %v4003_v5  ;;  %v4549_v5 = vld [vmem:[#allocation28_spill] sm:$0xff]  ;;  %s2123_s28 = sshll.u32 %s4206_s17, 4  ;;  %s2330_s29 = sshra.s32 %s2126_s18, 4  ;;  %s2124_s28 = int_to_ptr.vmem [resolvable:$true] %s2123_s28  ;;  %s2331_s29 = int_to_ptr.hbm [resolvable:$true] %s2330_s29 }
 0x207   : > { %2228 = vmatmul.msk.bf16.gmra.mxu1 %vm1851_vm0, %v3906_v36  ;;  %v1397_v21 = vpop.permute.xlu1 %1396  ;;  %1439 = vrot.lane.b32.xlu2 %v3842_v39, %s2385_s14  ;;  %s2332_s9 = scalar_lea.hbm %s2331_s29, 256  ;;  %p2337_p0 = scmp.lt.s32.totalorder %s2331_s29, %s4386_s7 }
 0x208   : > { %v1442_v0 = vpop.permute.xlu0 %1441  ;;  %v1693_v53 = vsel %vm1683_vm15, %v1660_v49, %v1397_v21  ;;  %p2333_p11 = scmp.ne.s32.totalorder %s2331_s29, %s2332_s9  ;;  %p2338_p1 = scmp.lt.s32.totalorder %s2336_s16, %s2332_s9 }
 0x209   : > { %v1734_v19 = vsel %vm1716_vm2, %v1701_v42, %v1442_v0  ;;  %v1415_v22 = vpop.permute.xlu2 %1414  ;;  %v1726_v11 = vsel %vm1716_vm2, %v1693_v53, %v1434_v2  ;;  %v1577_v42 = vsel %vm331_vm1, %v4552_v7, %v3930_v45 }
 0x20a   : > { %v1767_v57 = vsel %vm1749_vm4, %v1734_v19, %v4545_v35  ;;  %p2334_p12 = pnand %p2333_p11, %p2469_p5  ;;  %p2339_p2 = por %p2338_p1, %p2337_p0 }
 0x20b   : > { %v1800_v36 = vsel %vm1782_vm3, %v1767_v57, %v4546_v15 }
 0x20c   : > { %2235 = vmatmul.msk.bf16.vlgmr.msra.gmra.mxu2 %vm1851_vm0, %v1800_v36  ;;  %p2335_p13 = pneg %p2334_p12 }
 0x20e   : > { %1481 = vrot.lane.b32.xlu0 %v3791_v30, %s2386_s15  ;;  %p2340_p3 = pnand %p2339_p2, %p2335_p13 }
 0x20f   : > { %v1513_v28 = vpop.permute.xlu1 %1512 }
 0x210   : > { %v1258_v9 = vpop.permute.xlu0 %1257 }
 0x211   : > { %v1637_v41 = vsel %vm1617_vm13, %v1604_v12, %v1258_v9  ;;  %v1531_v61 = vpop.permute.xlu2 %1530 }
 0x212   : > { %v1670_v58 = vsel %vm1650_vm14, %v1637_v41, %v4547_v48 }
 0x213   : > { %v1703_v55 = vsel %vm1683_vm15, %v1670_v58, %v4548_v24 }
 0x214   : > { %v1736_v34 = vsel %vm1716_vm2, %v1703_v55, %v4549_v5 }
 0x215   : > { %v1769_v26 = vsel %vm1749_vm4, %v1736_v34, %v4550_v37 }
 0x216   : > { %v1802_v62 = vsel %vm1782_vm3, %v1769_v26, %v4551_v51 }
 0x217   : > { %2229 = vmatmul.msk.bf16.gmra.mxu1 %vm1851_vm0, %v4007_v17  ;;  %v1378_v30 = vpop.permute.xlu1 %1377 }
 0x218   : > { %v1476_v39 = vpop.permute.xlu0 %1475 }
 0x219   : > { %v1399_v17 = vpop.permute.xlu2 %1398 }
 0x21c   : > { %2236 = vmatmul.msk.bf16.gmra.mxu2 %vm1851_vm0, %v1802_v62 }
 0x21f   : > { %v1494_v10 = vpop.permute.xlu1 %1493 }
 0x220   : > { %v1266_v18 = vpop.permute.xlu0 %1265 }
 0x221   : > { %v1515_v46 = vpop.permute.xlu2 %1514 }
 0x227   : > { %2230 = vmatmul.msk.bf16.gmra.mxu1 %vm1851_vm0, %v1790_v54  ;;  %v1362_v40 = vpop.permute.xlu1 %1361  ;;  %v1759_v54 = vsel %vm1749_vm4, %v1726_v11, %v1476_v39 }
 0x228   : > { %v1452_v23 = vpop.permute.xlu0 %1451  ;;  %v1792_v27 = vsel %vm1782_vm3, %v1759_v54, %v1513_v28 }
 0x229   : > { %v1380_v8 = vpop.permute.xlu2 %1379 }
 0x22c   : > { %2237 = vmatmul.msk.bf16.gmra.mxu2 %vm1851_vm0, %v3940_v13 }
 0x22f   : > { %v1478_v32 = vpop.permute.xlu1 %1477 }
 0x230   : > { %v1250_v4 = vpop.permute.xlu0 %1249 }
 0x231   : > { %v1629_v14 = vsel %vm1617_vm13, %v3943_v63, %v1250_v4  ;;  %v1496_v16 = vpop.permute.xlu2 %1495 }
 0x232   : > { %v1662_v3 = vsel %vm1650_vm14, %v1629_v14, %v1362_v40  ;;  %v4189_v40 = vld [vmem:[%s4384_s5] ss:$0 sm:$0xff] }
 0x233   : > { %v1695_v13 = vsel %vm1683_vm15, %v1662_v3, %v1399_v17 }
 0x237   : > { %v1268_v38 = vpop.permute.xlu1 %1267  ;;  %2231 = vmatmul.msk.bf16.gmra.mxu1 %vm1851_vm0, %v1792_v27 }
 0x238   : > { %v1436_v20 = vpop.permute.xlu0 %1435 }
 0x239   : > { %v1728_v2 = vsel %vm1716_vm2, %v1695_v13, %v1436_v20  ;;  %v1364_v0 = vpop.permute.xlu2 %1363 }
 0x23a   : > { %v1761_v59 = vsel %vm1749_vm4, %v1728_v2, %v1478_v32 }
 0x23b   : > { %v1794_v44 = vsel %vm1782_vm3, %v1761_v59, %v1515_v46 }
 0x23c   : > { %2238 = vmatmul.msk.bf16.gmra.mxu2 %vm1851_vm0, %v4030_v31  ;;  %v1612_v31 = vsel %vm1584_vm12, %v1577_v42, %v1229_v25 }
 0x23d   : > { %v1645_v19 = vsel %vm1617_vm13, %v1612_v31, %v1266_v18 }
 0x23e   : > { %v1678_v15 = vsel %vm1650_vm14, %v1645_v19, %v1378_v30 }
 0x23f   : > { %v1454_v47 = vpop.permute.xlu1 %1453  ;;  %v1711_v36 = vsel %vm1683_vm15, %v1678_v15, %v1415_v22  ;;  %v1580_v22 = vsel %vm331_vm1, %v3632_v50, %v3970_v1 }
 0x240   : > { %v1231_v33 = vpop.permute.xlu0 %1230  ;;  %v1744_v28 = vsel %vm1716_vm2, %v1711_v36, %v1452_v23 }
 0x241   : > { %v1480_v45 = vpop.permute.xlu2 %1479  ;;  %v1614_v58 = vsel %vm1584_vm12, %v1580_v22, %v1231_v33 }
 0x242   : > { %v1647_v24 = vsel %vm1617_vm13, %v1614_v58, %v1268_v38 }
 0x243   : > { %v1680_v39 = vsel %vm1650_vm14, %v1647_v24, %v1380_v8 }
 0x247   : > { %2232 = vmatmul.msk.bf16.gmra.mxu1 %vm1851_vm0, %v1794_v44  ;;  %v1252_v63 = vpop.permute.xlu1 %1251 }
 0x248   : > { %v1417_v21 = vpop.permute.xlu0 %1416  ;;  %v1631_v29 = vsel %vm1617_vm13, %v4012_v60, %v1252_v63 }
 0x249   : > { %v1664_v25 = vsel %vm1650_vm14, %v1631_v29, %v1364_v0  ;;  %v1270_v5 = vpop.permute.xlu2 %1269  ;;  %v1713_v1 = vsel %vm1683_vm15, %v1680_v39, %v1417_v21 }
 0x24a   : > { %v1746_v37 = vsel %vm1716_vm2, %v1713_v1, %v1454_v47 }
 0x24c   : > { %2239 = vmatmul.msk.bf16.gmra.mxu2 %vm1851_vm0, %v4082_v43  ;;  %v1777_v43 = vsel %vm1749_vm4, %v1744_v28, %v1494_v10 }
 0x24d   : > { %v1810_v48 = vsel %vm1782_vm3, %v1777_v43, %v1531_v61  ;;  %v1779_v61 = vsel %vm1749_vm4, %v1746_v37, %v1496_v16 }
 0x24f   : > { %v1438_v35 = vpop.permute.xlu1 %1437 }
 0x250   : > { %v1533_v57 = vpop.permute.xlu0 %1532 }
 0x251   : > { %v1456_v51 = vpop.permute.xlu2 %1455  ;;  %v1812_v62 = vsel %vm1782_vm3, %v1779_v61, %v1533_v57 }
 0x257   : > { %v1233_v9 = vpop.permute.xlu1 %1232 }
 0x258   : > { %v1401_v12 = vpop.permute.xlu0 %1400  ;;  %v1616_v10 = vsel %vm1584_vm12, %v3990_v52, %v1233_v9 }
 0x259   : > { %v1697_v41 = vsel %vm1683_vm15, %v1664_v25, %v1401_v12  ;;  %v1649_v17 = vsel %vm1617_vm13, %v1616_v10, %v1270_v5  ;;  %v1254_v46 = vpop.permute.xlu2 %1253 }
 0x25a   : > { %v1730_v60 = vsel %vm1716_vm2, %v1697_v41, %v1438_v35  ;;  %v1633_v20 = vsel %vm1617_vm13, %v4111_v6, %v1254_v46 }
 0x25b   : > { %v1763_v30 = vsel %vm1749_vm4, %v1730_v60, %v1480_v45 }
 0x25c   : > { %2240 = vmatmul.msk.bf16.gmra.mxu2 %vm1851_vm0, %v1810_v48 }
 0x25f   : > { %v1419_v50 = vpop.permute.xlu1 %1418 }
 0x260   : > { %v1517_v55 = vpop.permute.xlu0 %1516 }
 0x261   : > { %v1796_v34 = vsel %vm1782_vm3, %v1763_v30, %v1517_v55  ;;  %v1440_v16 = vpop.permute.xlu2 %1439 }
 0x262   : > { %2233 = vmatmul.msk.bf16.gmra.mxu1 %vm1851_vm0, %v1796_v34 }
 0x267   : > { %v1535_v18 = vpop.permute.xlu1 %1534 }
 0x268   : > { %v1382_v26 = vpop.permute.xlu0 %1381 }
 0x269   : > { %v1682_v49 = vsel %vm1650_vm14, %v1649_v17, %v1382_v26 }
 0x26a   : > { %v1715_v32 = vsel %vm1683_vm15, %v1682_v49, %v1419_v50 }
 0x26b   : > { %v1748_v27 = vsel %vm1716_vm2, %v1715_v32, %v1456_v51 }
 0x26c   : > { %2241 = vmatmul.msk.bf16.gmra.mxu2 %vm1851_vm0, %v1812_v62 }
 0x26f   : > { %v1403_v4 = vpop.permute.xlu1 %1402 }
 0x270   : > { %v1498_v23 = vpop.permute.xlu0 %1497 }
 0x271   : > { %v1781_v38 = vsel %vm1749_vm4, %v1748_v27, %v1498_v23 }
 0x272   : > { %v1814_v47 = vsel %vm1782_vm3, %v1781_v38, %v1535_v18 }
 0x274   : > { %v1896_v53 = vpop.f32.mrf.mxu1 }
 0x275   : > { %v1979_v52 = vmul.f32 %v4189_v40, %v1896_v53 }
 0x277   : > { %v2014_v11 = vadd.f32 %v4196_v56, %v1979_v52  ;;  %v1519_v63 = vpop.permute.xlu1 %1518 }
 0x278   : > { %v1366_v14 = vpop.permute.xlu0 %1365 }
 0x279   : > { %v2046_v54 = vmax.f32 %v2014_v11, 0.0  ;;  %v1666_v3 = vsel %vm1650_vm14, %v1633_v20, %v1366_v14 }
 0x27a   : > { %v1699_v33 = vsel %vm1683_vm15, %v1666_v3, %v1403_v4 }
 0x27b   : > { %2078 = vst.msk [vmem:[%s4206_s17] sm:$0xff] %vm1650_vm14, %v2046_v54  ;;  %v1732_v6 = vsel %vm1716_vm2, %v1699_v33, %v1440_v16 }
 0x27c   : > { %v1898_v8 = vpop.f32.mrf.mxu1  ;;  %2242 = vmatmul.msk.bf16.gmra.mxu2 %vm1851_vm0, %v1814_v47 }
 0x27d   : > { %v1980_v13 = vmul.f32 %v4189_v40, %v1898_v8 }
 0x27f   : > { %v2015_v2 = vadd.f32 %v4196_v56, %v1980_v13 }
 0x280   : > { %v1482_v44 = vpop.permute.xlu0 %1481 }
 0x281   : > { %v2047_v59 = vmax.f32 %v2015_v2, 0.0  ;;  %v1765_v21 = vsel %vm1749_vm4, %v1732_v6, %v1482_v44 }
 0x282   : > { %v1798_v31 = vsel %vm1782_vm3, %v1765_v21, %v1519_v63 }
 0x283   : > { %2079 = vst.msk [vmem:[%s4206_s17 + $0x8] sm:$0xff] %vm1650_vm14, %v2047_v59  ;;  %2234 = vmatmul.msk.bf16.gmra.mxu1 %vm1851_vm0, %v1798_v31 }
 0x284   : > { %v1901_v7 = vpop.f32.mrf.mxu1 }
 0x285   : > { %v1981_v42 = vmul.f32 %v4189_v40, %v1901_v7 }
 0x287   : > { %v2016_v0 = vadd.f32 %v4196_v56, %v1981_v42 }
 0x289   : > { %v2048_v19 = vmax.f32 %v2016_v0, 0.0 }
 0x28b   : > { %2080 = vst.msk [vmem:[%s4206_s17 + $0x10] sm:$0xff] %vm1650_vm14, %v2048_v19 }
 0x28c   : > { %v1903_v35 = vpop.f32.mrf.mxu1 }
 0x28d   : > { %v1982_v57 = vmul.f32 %v4189_v40, %v1903_v35 }
 0x28f   : > { %v2017_v15 = vadd.f32 %v4196_v56, %v1982_v57  ;;  %v1936_v28 = vpop.f32.mrf.mxu2 }
 0x290   : > { %v1995_v29 = vmul.f32 %v4189_v40, %v1936_v28 }
 0x291   : > { %v2049_v36 = vmax.f32 %v2017_v15, 0.0 }
 0x292   : > { %v2030_v12 = vadd.f32 %v4196_v56, %v1995_v29 }
 0x293   : > { %2081 = vst.msk [vmem:[%s4206_s17 + $0x18] sm:$0xff] %vm1650_vm14, %v2049_v36 }
 0x294   : > { %v1906_v45 = vpop.f32.mrf.mxu1  ;;  %v2062_v9 = vmax.f32 %v2030_v12, 0.0 }
 0x295   : > { %v1983_v43 = vmul.f32 %v4189_v40, %v1906_v45 }
 0x296   : > { %2094 = vst.msk [vmem:[%s4206_s17 + $0x80] sm:$0xff] %vm1650_vm14, %v2062_v9 }
 0x297   : > { %v2018_v25 = vadd.f32 %v4196_v56, %v1983_v43  ;;  %v1938_v48 = vpop.f32.mrf.mxu2 }
 0x298   : > { %v1996_v22 = vmul.f32 %v4189_v40, %v1938_v48 }
 0x299   : > { %v2050_v41 = vmax.f32 %v2018_v25, 0.0 }
 0x29a   : > { %v2031_v60 = vadd.f32 %v4196_v56, %v1996_v22 }
 0x29b   : > { %2082 = vst.msk [vmem:[%s4206_s17 + $0x20] sm:$0xff] %vm1650_vm14, %v2050_v41 }
 0x29c   : > { %v1908_v58 = vpop.f32.mrf.mxu1  ;;  %v2063_v55 = vmax.f32 %v2031_v60, 0.0 }
 0x29d   : > { %v1984_v24 = vmul.f32 %v4189_v40, %v1908_v58 }
 0x29e   : > { %2095 = vst.msk [vmem:[%s4206_s17 + $0x88] sm:$0xff] %vm1650_vm14, %v2063_v55 }
 0x29f   : > { %v2019_v30 = vadd.f32 %v4196_v56, %v1984_v24  ;;  %v1941_v34 = vpop.f32.mrf.mxu2 }
 0x2a0   : > { %v1997_v39 = vmul.f32 %v4189_v40, %v1941_v34 }
 0x2a1   : > { %v2051_v5 = vmax.f32 %v2019_v30, 0.0 }
 0x2a2   : > { %v2032_v1 = vadd.f32 %v4196_v56, %v1997_v39 }
 0x2a3   : > { %2083 = vst.msk [vmem:[%s4206_s17 + $0x28] sm:$0xff] %vm1650_vm14, %v2051_v5 }
 0x2a4   : > { %v1911_v50 = vpop.f32.mrf.mxu1  ;;  %v2064_v26 = vmax.f32 %v2032_v1, 0.0 }
 0x2a5   : > { %v1985_v37 = vmul.f32 %v4189_v40, %v1911_v50 }
 0x2a6   : > { %2096 = vst.msk [vmem:[%s4206_s17 + $0x90] sm:$0xff] %vm1650_vm14, %v2064_v26 }
 0x2a7   : > { %v2020_v61 = vadd.f32 %v4196_v56, %v1985_v37  ;;  %v1943_v62 = vpop.f32.mrf.mxu2 }
 0x2a8   : > { %v1998_v10 = vmul.f32 %v4189_v40, %v1943_v62 }
 0x2a9   : > { %v2052_v51 = vmax.f32 %v2020_v61, 0.0 }
 0x2aa   : > { %v2033_v17 = vadd.f32 %v4196_v56, %v1998_v10 }
 0x2ab   : > { %2084 = vst.msk [vmem:[%s4206_s17 + $0x30] sm:$0xff] %vm1650_vm14, %v2052_v51 }
 0x2ac   : > { %v1913_v18 = vpop.f32.mrf.mxu1  ;;  %v2065_v49 = vmax.f32 %v2033_v17, 0.0 }
 0x2ad   : > { %v1986_v23 = vmul.f32 %v4189_v40, %v1913_v18 }
 0x2ae   : > { %2097 = vst.msk [vmem:[%s4206_s17 + $0x98] sm:$0xff] %vm1650_vm14, %v2065_v49 }
 0x2af   : > { %v2021_v53 = vadd.f32 %v4196_v56, %v1986_v23  ;;  %v1946_v32 = vpop.f32.mrf.mxu2 }
 0x2b0   : > { %v1999_v11 = vmul.f32 %v4189_v40, %v1946_v32 }
 0x2b1   : > { %v2053_v52 = vmax.f32 %v2021_v53, 0.0 }
 0x2b2   : > { %v2034_v54 = vadd.f32 %v4196_v56, %v1999_v11 }
 0x2b3   : > { %2085 = vst.msk [vmem:[%s4206_s17 + $0x38] sm:$0xff] %vm1650_vm14, %v2053_v52 }
 0x2b4   : > { %v1916_v46 = vpop.f32.mrf.mxu1  ;;  %v2066_v27 = vmax.f32 %v2034_v54, 0.0 }
 0x2b5   : > { %v1987_v4 = vmul.f32 %v4189_v40, %v1916_v46 }
 0x2b6   : > { %2098 = vst.msk [vmem:[%s4206_s17 + $0xa0] sm:$0xff] %vm1650_vm14, %v2066_v27 }
 0x2b7   : > { %v2022_v38 = vadd.f32 %v4196_v56, %v1987_v4  ;;  %v1948_v20 = vpop.f32.mrf.mxu2 }
 0x2b8   : > { %v2000_v8 = vmul.f32 %v4189_v40, %v1948_v20 }
 0x2b9   : > { %v2054_v14 = vmax.f32 %v2022_v38, 0.0 }
 0x2ba   : > { %v2035_v13 = vadd.f32 %v4196_v56, %v2000_v8 }
 0x2bb   : > { %2086 = vst.msk [vmem:[%s4206_s17 + $0x40] sm:$0xff] %vm1650_vm14, %v2054_v14 }
 0x2bc   : > { %v1918_v3 = vpop.f32.mrf.mxu1  ;;  %v2067_v2 = vmax.f32 %v2035_v13, 0.0 }
 0x2bd   : > { %v1988_v47 = vmul.f32 %v4189_v40, %v1918_v3 }
 0x2be   : > { %2099 = vst.msk [vmem:[%s4206_s17 + $0xa8] sm:$0xff] %vm1650_vm14, %v2067_v2 }
 0x2bf   : > { %v2023_v33 = vadd.f32 %v4196_v56, %v1988_v47  ;;  %v1951_v16 = vpop.f32.mrf.mxu2 }
 0x2c0   : > { %v2001_v6 = vmul.f32 %v4189_v40, %v1951_v16 }
 0x2c1   : > { %v2055_v59 = vmax.f32 %v2023_v33, 0.0 }
 0x2c2   : > { %v2036_v63 = vadd.f32 %v4196_v56, %v2001_v6 }
 0x2c3   : > { %2087 = vst.msk [vmem:[%s4206_s17 + $0x48] sm:$0xff] %vm1650_vm14, %v2055_v59 }
 0x2c4   : > { %v1921_v44 = vpop.f32.mrf.mxu1  ;;  %v2068_v7 = vmax.f32 %v2036_v63, 0.0 }
 0x2c5   : > { %v1989_v21 = vmul.f32 %v4189_v40, %v1921_v44 }
 0x2c6   : > { %2100 = vst.msk [vmem:[%s4206_s17 + $0xb0] sm:$0xff] %vm1650_vm14, %v2068_v7 }
 0x2c7   : > { %v2024_v42 = vadd.f32 %v4196_v56, %v1989_v21  ;;  %v1953_v0 = vpop.f32.mrf.mxu2 }
 0x2c8   : > { %v2002_v19 = vmul.f32 %v4189_v40, %v1953_v0 }
 0x2c9   : > { %v2056_v31 = vmax.f32 %v2024_v42, 0.0 }
 0x2ca   : > { %v2037_v57 = vadd.f32 %v4196_v56, %v2002_v19 }
 0x2cb   : > { %2088 = vst.msk [vmem:[%s4206_s17 + $0x50] sm:$0xff] %vm1650_vm14, %v2056_v31 }
 0x2cc   : > { %v1923_v35 = vpop.f32.mrf.mxu1  ;;  %v2069_v36 = vmax.f32 %v2037_v57, 0.0 }
 0x2cd   : > { %v1990_v15 = vmul.f32 %v4189_v40, %v1923_v35 }
 0x2ce   : > { %2101 = vst.msk [vmem:[%s4206_s17 + $0xb8] sm:$0xff] %vm1650_vm14, %v2069_v36 }
 0x2cf   : > { %v2025_v28 = vadd.f32 %v4196_v56, %v1990_v15  ;;  %v1956_v45 = vpop.f32.mrf.mxu2 }
 0x2d0   : > { %v2003_v12 = vmul.f32 %v4189_v40, %v1956_v45 }
 0x2d1   : > { %v2057_v29 = vmax.f32 %v2025_v28, 0.0 }
 0x2d2   : > { %v2038_v43 = vadd.f32 %v4196_v56, %v2003_v12 }
 0x2d3   : > { %2089 = vst.msk [vmem:[%s4206_s17 + $0x58] sm:$0xff] %vm1650_vm14, %v2057_v29 }
 0x2d4   : > { %v2070_v9 = vmax.f32 %v2038_v43, 0.0 }
 0x2d6   : > { %2102 = vst.msk [vmem:[%s4206_s17 + $0xc0] sm:$0xff] %vm1650_vm14, %v2070_v9 }
 0x2d7   : > { %v1958_v25 = vpop.f32.mrf.mxu2 }
 0x2d8   : > { %v2004_v41 = vmul.f32 %v4189_v40, %v1958_v25 }
 0x2da   : > { %v2039_v48 = vadd.f32 %v4196_v56, %v2004_v41 }
 0x2dc   : > { %v2071_v22 = vmax.f32 %v2039_v48, 0.0 }
 0x2de   : > { %2103 = vst.msk [vmem:[%s4206_s17 + $0xc8] sm:$0xff] %vm1650_vm14, %v2071_v22 }
 0x2df   : > { %v1926_v58 = vpop.f32.mrf.mxu1  ;;  %v1961_v60 = vpop.f32.mrf.mxu2 }
 0x2e0   : > { %v1991_v24 = vmul.f32 %v4189_v40, %v1926_v58  ;;  %v2005_v55 = vmul.f32 %v4189_v40, %v1961_v60 }
 0x2e2   : > { %v2026_v30 = vadd.f32 %v4196_v56, %v1991_v24  ;;  %v2040_v5 = vadd.f32 %v4196_v56, %v2005_v55 }
 0x2e4   : > { %v2058_v34 = vmax.f32 %v2026_v30, 0.0  ;;  %v2072_v39 = vmax.f32 %v2040_v5, 0.0 }
 0x2e6   : > { %2090 = vst.msk [vmem:[%s4206_s17 + $0x60] sm:$0xff] %vm1650_vm14, %v2058_v34 }
 0x2e7   : > { %2104 = vst.msk [vmem:[%s4206_s17 + $0xd0] sm:$0xff] %vm1650_vm14, %v2072_v39  ;;  %v1928_v50 = vpop.f32.mrf.mxu1  ;;  %v1963_v1 = vpop.f32.mrf.mxu2 }
 0x2e8   : > { %v1992_v37 = vmul.f32 %v4189_v40, %v1928_v50  ;;  %v2006_v26 = vmul.f32 %v4189_v40, %v1963_v1 }
 0x2ea   : > { %v2027_v61 = vadd.f32 %v4196_v56, %v1992_v37  ;;  %v2041_v51 = vadd.f32 %v4196_v56, %v2006_v26 }
 0x2ec   : > { %v2059_v62 = vmax.f32 %v2027_v61, 0.0  ;;  %v2073_v10 = vmax.f32 %v2041_v51, 0.0 }
 0x2ee   : > { %2091 = vst.msk [vmem:[%s4206_s17 + $0x68] sm:$0xff] %vm1650_vm14, %v2059_v62 }
 0x2ef   : > { %2105 = vst.msk [vmem:[%s4206_s17 + $0xd8] sm:$0xff] %vm1650_vm14, %v2073_v10  ;;  %v1966_v18 = vpop.f32.mrf.mxu2 }
 0x2f0   : > { %v2007_v17 = vmul.f32 %v4189_v40, %v1966_v18 }
 0x2f2   : > { %v2042_v23 = vadd.f32 %v4196_v56, %v2007_v17 }
 0x2f4   : > { %v2074_v49 = vmax.f32 %v2042_v23, 0.0 }
 0x2f6   : > { %2106 = vst.msk [vmem:[%s4206_s17 + $0xe0] sm:$0xff] %vm1650_vm14, %v2074_v49 }
 0x2f7   : > { %v1968_v53 = vpop.f32.mrf.mxu2 }
 0x2f8   : > { %v2008_v52 = vmul.f32 %v4189_v40, %v1968_v53 }
 0x2fa   : > { %v2043_v32 = vadd.f32 %v4196_v56, %v2008_v52 }
 0x2fc   : > { %v2075_v11 = vmax.f32 %v2043_v32, 0.0 }
 0x2fe   : > { %2107 = vst.msk [vmem:[%s4206_s17 + $0xe8] sm:$0xff] %vm1650_vm14, %v2075_v11 }
 0x2ff   : > { %v1971_v46 = vpop.f32.mrf.mxu2 }
 0x300   : > { %v2009_v54 = vmul.f32 %v4189_v40, %v1971_v46  ;;  %v1931_v4 = vpop.f32.mrf.mxu1 }
 0x301   : > { %v1993_v27 = vmul.f32 %v4189_v40, %v1931_v4 }
 0x302   : > { %v2044_v38 = vadd.f32 %v4196_v56, %v2009_v54 }
 0x303   : > { %v2028_v14 = vadd.f32 %v4196_v56, %v1993_v27 }
 0x304   : > { %v2076_v20 = vmax.f32 %v2044_v38, 0.0 }
 0x305   : > { %v2060_v8 = vmax.f32 %v2028_v14, 0.0 }
 0x306   : > { %2108 = vst.msk [vmem:[%s4206_s17 + $0xf0] sm:$0xff] %vm1650_vm14, %v2076_v20 }
 0x307   : > { %2092 = vst.msk [vmem:[%s4206_s17 + $0x70] sm:$0xff] %vm1650_vm14, %v2060_v8  ;;  %v1973_v3 = vpop.f32.mrf.mxu2 }
 0x308   : > { %v2010_v13 = vmul.f32 %v4189_v40, %v1973_v3  ;;  %v1933_v47 = vpop.f32.mrf.mxu1 }
 0x309   : > { %v1994_v2 = vmul.f32 %v4189_v40, %v1933_v47 }
 0x30a   : > { %v2045_v33 = vadd.f32 %v4196_v56, %v2010_v13 }
 0x30b   : > { %v2029_v59 = vadd.f32 %v4196_v56, %v1994_v2 }
 0x30c   : > { %v2077_v16 = vmax.f32 %v2045_v33, 0.0 }
 0x30d   : > { %v2061_v6 = vmax.f32 %v2029_v59, 0.0 }
 0x30e   : > { %2109 = vst.msk [vmem:[%s4206_s17 + $0xf8] sm:$0xff] %vm1650_vm14, %v2077_v16 }
 0x30f   : > { %2093 = vst.msk [vmem:[%s4206_s17 + $0x78] sm:$0xff] %vm1650_vm14, %v2061_v6 }
 0x310   : > { %2343 = shalt.err (!%p2340_p3)
}
 0x311   : > { %s2390_s13 = smov 128  }
 0x312   : > { %2260 = dma.vmem_to_hbm [thread:$0]  (%p2469_p5), %s2124_s28, 4096, %s2126_s18, %s2111_s19, %s2390_s13, %s2390_s13, %s2382_s8  }
 0x313 PF: > { %p2266_p4 = scmp.ge.s32.totalorder %s2378_s27, 2  ;;  %s2140_s17 = sand.u32 1, %s2366_s24  }
 0x314   : > { %s2141_s22 = scalar_lea.sflag [#allocation3], %s2140_s17 }
 0x315   : > { %p2263_p7 = pnand %p2266_p4, %p2473_p6 }
 0x317   : > { %p2264_p8 = pneg %p2263_p7 }
 0x319   : > { %2361 = dma.done.wait (%p2264_p8), %s2141_s22, 4096  }
 0x31a   : > { %2363 = vsyncadd (%p2264_p8), %s2141_s22, 4294963200  ;;  %p17_p9 = scmp.ge.s32.totalorder %s2456_s30, 4   ;;  %s4553_s24 = smov %s2370_s25 }
 0x31b   : > { %s4554_s25 = smov %s2374_s26  ;;  %s4555_s26 = smov %s2467_s10 }
 0x31c   : > { %s4556_s27 = smov %s2456_s30  ;;  %19 = sbr.rel (!%p17_p9) target bundleno = 3 (0x3), region = 83 }
 0x321   :  { %2147 = vsyncpa [#allocation3], 1 }
 0x322   :  { %2149 = vsyncpa [#allocation3 + $0x1], 1 }

</bundles_post_ra>
